<compile_context>
chip_gen: v7x
topology: tpu7x:2x2x1
jax: 0.10.0
libtpu: 0.0.40
codegen_flags: <defaults>
</compile_context>

<pallas_src>
import math

import jax
import jax.numpy as jnp
import numpy as np
from jax.experimental import pallas as pl
from jax.experimental.pallas import tpu as pltpu


def _round_up(v, m):
    return (v + m - 1) // m * m


def _sigmoid_kernel(v):
    # exp on the EUP; approx reciprocal also on the EUP -> no VPU Newton-divide chain.
    return pl.reciprocal(1.0 + jnp.exp(-v), approx=True)


def _gru_tile_kernel(x_ref, w_ih_ref, w_hh_ref, b_x_ref, b_h_ref, w_fc_ref,
                     b_fc_ref, out_ref):
    """Whole GRU recurrence + output projection for one tile of rows.

    Grid: (num_row_tiles,)  -- marked "parallel" (megacore).

    x_ref:    (T, TILE_M, F)   bf16 input slab, time-major
    w_ih_ref: (F, 3*Hp)        bf16 fused input->gate weights, gate order (r | z | n)
    w_hh_ref: (Hp, 3*Hp)       bf16 fused hidden->gate weights (rows >= H are zero)
    b_x_ref:  (1, 3*Hp)        f32  [b_ir+b_hr | b_iz+b_hz | b_in]
    b_h_ref:  (1, 3*Hp)        f32  [0 | 0 | b_hn]
    w_fc_ref: (Hp, O)          bf16 output projection weight (rows >= H are zero)
    b_fc_ref: (1, O)           f32  output projection bias
    out_ref:  (TILE_M, O)      f32  final projection
    """
    seq_len, tile_m, _ = x_ref.shape
    hp = w_hh_ref.shape[0]

    # Hoist loop-invariant loads / broadcasts out of the time loop
    # (JAX does not CSE broadcast_in_dim inside loops).
    w_ih = w_ih_ref[...]
    w_hh = w_hh_ref[...]
    b_x = jnp.broadcast_to(b_x_ref[...], (tile_m, 3 * hp))
    b_h = jnp.broadcast_to(b_h_ref[...], (tile_m, 3 * hp))

    def step(t, h):
        x_t = x_ref[t]                                                  # (tile_m, F) bf16
        gx = jnp.dot(x_t, w_ih, preferred_element_type=jnp.float32) + b_x
        gh = jnp.dot(h.astype(jnp.bfloat16), w_hh,
                     preferred_element_type=jnp.float32) + b_h
        r = _sigmoid_kernel(gx[:, 0:hp] + gh[:, 0:hp])
        z = _sigmoid_kernel(gx[:, hp:2 * hp] + gh[:, hp:2 * hp])
        n = jnp.tanh(gx[:, 2 * hp:3 * hp] + r * gh[:, 2 * hp:3 * hp])
        # (1 - z) * n + z * h  ==  n + z * (h - n): one fewer full-tile VPU pass.
        return n + z * (h - n)

    h0 = jnp.zeros((tile_m, hp), jnp.float32)
    unroll = True if seq_len <= 32 else 8
    h_last = jax.lax.fori_loop(0, seq_len, step, h0, unroll=unroll)

    proj = jnp.dot(h_last.astype(jnp.bfloat16), w_fc_ref[...],
                   preferred_element_type=jnp.float32)
    out_ref[...] = (proj + b_fc_ref[...]).astype(out_ref.dtype)


def gru_project_rows(x_tmf, w_ih_fused, w_hh_fused, b_x, b_h, w_fc, b_fc, *,
                     max_tile_m=1024):
    """x_tmf: (T, M, F) bf16 rows in (s*B + b) order. Returns (M, O) f32."""
    T, M, F = x_tmf.shape
    Hp = w_hh_fused.shape[0]
    O = w_fc.shape[-1]

    # Row tiling: 16-aligned (bf16 sublane packing).  When there is enough work, split
    # into >= 2 tiles so the "parallel" grid axis can feed both v7x TensorCores.
    m16 = _round_up(M, 16)
    if m16 >= 512:
        tile_m = min(max_tile_m, _round_up((m16 + 1) // 2, 16))
    else:
        tile_m = min(max_tile_m, m16)
    m_pad = _round_up(m16, tile_m)
    if m_pad != M:
        x_tmf = jnp.pad(x_tmf, ((0, 0), (0, m_pad - M), (0, 0)))
    num_tiles = m_pad // tile_m

    # Explicit VMEM budget (v7x: 64 MiB physical / 32 MiB scoped default).
    x_block = 2 * T * tile_m * F * 2                       # double-buffered bf16 x slab
    out_block = 2 * tile_m * O * 4
    weights = 2 * ((F * 3 * Hp + Hp * 3 * Hp + Hp * O) * 2 + (2 * 3 * Hp + O) * 4)
    live = 10 * tile_m * 3 * Hp * 4                        # gx/gh/bias-bcast/h/gate temps
    vmem_limit = int(min(max((x_block + out_block + weights + live) * 3 // 2,
                             8 * 1024 * 1024), 40 * 1024 * 1024))

    flops = 2 * m_pad * T * 3 * Hp * (F + Hp) + 2 * m_pad * Hp * O
    transcendentals = 3 * m_pad * T * Hp
    bytes_accessed = (2 * T * m_pad * F + 4 * m_pad * O
                      + 2 * (F * 3 * Hp + Hp * 3 * Hp + Hp * O)
                      + 4 * (2 * 3 * Hp + O))

    out = pl.pallas_call(
        _gru_tile_kernel,
        out_shape=jax.ShapeDtypeStruct((m_pad, O), jnp.float32),
        grid_spec=pltpu.PrefetchScalarGridSpec(
            num_scalar_prefetch=0,
            grid=(num_tiles,),
            in_specs=[
                pl.BlockSpec((T, tile_m, F), lambda i: (0, i, 0)),     # x slab (per tile)
                # NOTE: resident weight/bias blocks below have constant index maps; at
                # production-sized H on v7x they should be single-buffered to stay well
                # inside the 64 MiB VMEM — tiny at these dims, so left at the default.
                pl.BlockSpec((F, 3 * Hp), lambda i: (0, 0)),           # w_ih (resident)
                pl.BlockSpec((Hp, 3 * Hp), lambda i: (0, 0)),          # w_hh (resident)
                pl.BlockSpec((1, 3 * Hp), lambda i: (0, 0)),           # folded x-side biases
                pl.BlockSpec((1, 3 * Hp), lambda i: (0, 0)),           # h-side bias (b_hn)
                pl.BlockSpec((Hp, O), lambda i: (0, 0)),               # w_fc
                pl.BlockSpec((1, O), lambda i: (0, 0)),                # b_fc
            ],
            out_specs=pl.BlockSpec((tile_m, O), lambda i: (i, 0)),
        ),
        compiler_params=pltpu.CompilerParams(
            dimension_semantics=("parallel",),
            vmem_limit_bytes=vmem_limit,
        ),
        cost_estimate=pl.CostEstimate(
            flops=int(flops),
            transcendentals=int(transcendentals),
            bytes_accessed=int(bytes_accessed),
        ),
    )(x_tmf, w_ih_fused, w_hh_fused, b_x, b_h, w_fc, b_fc)
    return out[:M]


class SpatialTemporalFeatureAggregatorPallas:
    """JAX/Pallas port of SpatialTemporalFeatureAggregator. Params created deterministically."""

    def __init__(self, input_dim, hidden_dim, output_dim, spatial_size, seed=0):
        self.input_dim = input_dim
        self.hidden_dim = hidden_dim
        self.output_dim = output_dim
        self.spatial_size = spatial_size
        self.hidden_pad = _round_up(hidden_dim, 128)

        key = jax.random.PRNGKey(seed)
        k1, k2, k3, k4, k5, k6 = jax.random.split(key, 6)
        k_gru = 1.0 / math.sqrt(hidden_dim)
        # PyTorch stores weight_ih_l0 as (3H, F) with gate order (r, z, n); reference params
        # kept in the transposed per-gate form (3, F, H)/(3, H, H), f32.
        w_ih = jax.random.uniform(k1, (3, input_dim, hidden_dim), jnp.float32, -k_gru, k_gru)
        w_hh = jax.random.uniform(k2, (3, hidden_dim, hidden_dim), jnp.float32, -k_gru, k_gru)
        b_ih = jax.random.uniform(k3, (3, hidden_dim), jnp.float32, -k_gru, k_gru)
        b_hh = jax.random.uniform(k4, (3, hidden_dim), jnp.float32, -k_gru, k_gru)
        k_fc = 1.0 / math.sqrt(hidden_dim)
        w_fc = jax.random.uniform(k5, (hidden_dim, output_dim), jnp.float32, -k_fc, k_fc)
        b_fc = jax.random.uniform(k6, (1, output_dim), jnp.float32, -k_fc, k_fc)

        self.params = dict(w_ih=w_ih, w_hh=w_hh, b_ih=b_ih, b_hh=b_hh, w_fc=w_fc, b_fc=b_fc)

        # --- Kernel-side fused / 128-lane-padded / bf16 parameters --------------------
        Hp = self.hidden_pad
        pad_h = Hp - hidden_dim

        def pad_cols(w):  # (in, H) -> (in, Hp)
            return jnp.pad(w, ((0, 0), (0, pad_h)))

        def pad_vec(v):   # (H,) -> (Hp,)
            return jnp.pad(v, (0, pad_h))

        w_ih_fused = jnp.concatenate([pad_cols(w_ih[g]) for g in range(3)], axis=1)
        w_hh_fused = jnp.concatenate([pad_cols(w_hh[g]) for g in range(3)], axis=1)
        w_hh_fused = jnp.pad(w_hh_fused, ((0, pad_h), (0, 0)))   # zero rows for padded h cols

        # b_ih + b_hh fold for r/z; b_hn stays on the hidden side (multiplied by r).
        b_x = jnp.concatenate([pad_vec(b_ih[0] + b_hh[0]),
                               pad_vec(b_ih[1] + b_hh[1]),
                               pad_vec(b_ih[2])]).reshape(1, 3 * Hp)
        b_h = jnp.concatenate([jnp.zeros((2 * Hp,), jnp.float32),
                               pad_vec(b_hh[2])]).reshape(1, 3 * Hp)
        w_fc_pad = jnp.pad(w_fc, ((0, pad_h), (0, 0)))

        self.kernel_params = dict(
            w_ih=w_ih_fused.astype(jnp.bfloat16),
            w_hh=w_hh_fused.astype(jnp.bfloat16),
            b_x=b_x,
            b_h=b_h,
            w_fc=w_fc_pad.astype(jnp.bfloat16),
            b_fc=b_fc,
        )

    def __call__(self, x):
        # x: (S, T, B, F) — same layout the PyTorch forward receives.
        S, T, B, Fdim = x.shape
        Hs, Ws = self.spatial_size
        assert S == Hs * Ws, "spatial_size must satisfy H*W == S"
        kp = self.kernel_params

        # PyTorch: x.permute(0,2,1,3).contiguous().view(B*S, T, F) -> rows ordered s*B + b.
        # We additionally put T first so every time step reads a clean lane-dense
        # (TILE_M, F) slab, and cast the streamed activations to bf16 (halves HBM traffic).
        x_tmf = jnp.transpose(x, (1, 0, 2, 3)).reshape(T, S * B, Fdim).astype(jnp.bfloat16)

        proj = gru_project_rows(x_tmf, kp["w_ih"], kp["w_hh"], kp["b_x"], kp["b_h"],
                                kp["w_fc"], kp["b_fc"])

        # proj rows are produced in (s*B + b) order; PyTorch then does
        # .view(B, S, -1) -> .view(B, H, W, -1) -> permute(0, 3, 1, 2), which is a plain
        # row-major reinterpretation of those rows.  Replicated verbatim here.
        out = proj.reshape(B, Hs, Ws, self.output_dim)
        return jnp.transpose(out, (0, 3, 1, 2))


def _reference(x, params, spatial_size, output_dim):
    """Plain-JAX f32 reference matching the PyTorch forward semantics."""
    S, T, B, Fdim = x.shape
    w_ih, w_hh = params["w_ih"], params["w_hh"]
    b_ih, b_hh = params["b_ih"], params["b_hh"]
    w_fc, b_fc = params["w_fc"], params["b_fc"]
    hp = jax.lax.Precision.HIGHEST

    rows = jnp.transpose(x, (0, 2, 1, 3)).reshape(S * B, T, Fdim).astype(jnp.float32)
    h = jnp.zeros((S * B, w_hh.shape[-1]), jnp.float32)
    for t in range(T):
        xt = rows[:, t, :]
        r = jax.nn.sigmoid(jnp.dot(xt, w_ih[0], precision=hp) + b_ih[0]
                           + jnp.dot(h, w_hh[0], precision=hp) + b_hh[0])
        z = jax.nn.sigmoid(jnp.dot(xt, w_ih[1], precision=hp) + b_ih[1]
                           + jnp.dot(h, w_hh[1], precision=hp) + b_hh[1])
        n = jnp.tanh(jnp.dot(xt, w_ih[2], precision=hp) + b_ih[2]
                     + r * (jnp.dot(h, w_hh[2], precision=hp) + b_hh[2]))
        h = (1.0 - z) * n + z * h
    proj = jnp.dot(h, w_fc, precision=hp) + b_fc
    Hs, Ws = spatial_size
    out = proj.reshape(B, Hs, Ws, output_dim)
    return jnp.transpose(out, (0, 3, 1, 2))


if __name__ == "__main__":
    SPATIAL = (4, 4)                        # H, W
    S = SPATIAL[0] * SPATIAL[1]             # 16 spatial tokens
    T, B = 6, 2
    INPUT_DIM, HIDDEN_DIM, OUTPUT_DIM = 32, 64, 128

    module = SpatialTemporalFeatureAggregatorPallas(
        INPUT_DIM, HIDDEN_DIM, OUTPUT_DIM, SPATIAL, seed=0)

    x = jax.random.normal(jax.random.PRNGKey(0), (S, T, B, INPUT_DIM), jnp.float32)

    out = jax.block_until_ready(module(x))
    assert out.shape == (B, OUTPUT_DIM, SPATIAL[0], SPATIAL[1])

    ref = _reference(x, module.params, SPATIAL, OUTPUT_DIM)
    # Tolerance relaxed vs. the pure-f32 version: kernel matmul operands are bf16
    # (f32 accumulation, f32 elementwise) against a HIGHEST-precision f32 reference.
    np.testing.assert_allclose(np.asarray(out), np.asarray(ref), rtol=3e-2, atol=3e-2)

    print("KERNEL_OK")
</pallas_src>

<mosaic_0001>
module attributes {stable_mosaic.version = 11 : i64} {
  func.func @_gru_tile_kernel(%arg0: i32, %arg1: memref<6x32x32xbf16, #tpu.memory_space<vmem>>, %arg2: memref<32x384xbf16, #tpu.memory_space<vmem>>, %arg3: memref<128x384xbf16, #tpu.memory_space<vmem>>, %arg4: memref<1x384xf32, #tpu.memory_space<vmem>>, %arg5: memref<1x384xf32, #tpu.memory_space<vmem>>, %arg6: memref<128x128xbf16, #tpu.memory_space<vmem>>, %arg7: memref<1x128xf32, #tpu.memory_space<vmem>>, %arg8: memref<32x128xf32, #tpu.memory_space<vmem>>) attributes {dimension_semantics = [#tpu.dimension_semantics<parallel>], iteration_bounds = array<i64: 1>, scalar_prefetch = 0 : i64, scratch_operands = 0 : i64, tpu.core_type = #tpu.core_type<tc>, window_params = [{transform_indices = @transform_0, window_bounds = array<i64: 6, 32, 32>}, {pipeline_mode = #tpu.pipeline_mode<synchronous>, transform_indices = @transform_1, window_bounds = array<i64: 32, 384>}, {pipeline_mode = #tpu.pipeline_mode<synchronous>, transform_indices = @transform_2, window_bounds = array<i64: 128, 384>}, {pipeline_mode = #tpu.pipeline_mode<synchronous>, transform_indices = @transform_3, window_bounds = array<i64: 1, 384>}, {pipeline_mode = #tpu.pipeline_mode<synchronous>, transform_indices = @transform_4, window_bounds = array<i64: 1, 384>}, {pipeline_mode = #tpu.pipeline_mode<synchronous>, transform_indices = @transform_5, window_bounds = array<i64: 128, 128>}, {pipeline_mode = #tpu.pipeline_mode<synchronous>, transform_indices = @transform_6, window_bounds = array<i64: 1, 128>}, {transform_indices = @transform_7, window_bounds = array<i64: 32, 128>}]} {
    %c0 = arith.constant 0 : index
    %c0_0 = arith.constant 0 : index
    %0 = vector.load %arg2[%c0, %c0_0] : memref<32x384xbf16, #tpu.memory_space<vmem>>, vector<32x384xbf16>
    %c0_1 = arith.constant 0 : index
    %c0_2 = arith.constant 0 : index
    %1 = vector.load %arg3[%c0_1, %c0_2] : memref<128x384xbf16, #tpu.memory_space<vmem>>, vector<128x384xbf16>
    %c0_3 = arith.constant 0 : index
    %c0_4 = arith.constant 0 : index
    %2 = vector.load %arg4[%c0_3, %c0_4] : memref<1x384xf32, #tpu.memory_space<vmem>>, vector<1x384xf32>
    %3 = vector.shape_cast %2 : vector<1x384xf32> to vector<1x384xf32>
    %4 = vector.broadcast %3 : vector<1x384xf32> to vector<32x384xf32>
    %c0_5 = arith.constant 0 : index
    %c0_6 = arith.constant 0 : index
    %5 = vector.load %arg5[%c0_5, %c0_6] : memref<1x384xf32, #tpu.memory_space<vmem>>, vector<1x384xf32>
    %6 = vector.shape_cast %5 : vector<1x384xf32> to vector<1x384xf32>
    %7 = vector.broadcast %6 : vector<1x384xf32> to vector<32x384xf32>
    %cst = arith.constant 0.000000e+00 : f32
    %8 = vector.broadcast %cst : f32 to vector<32x128xf32>
    %c0_i32 = arith.constant 0 : i32
    %9 = arith.index_cast %c0_i32 : i32 to index
    %c0_7 = arith.constant 0 : index
    %c0_8 = arith.constant 0 : index
    %10 = vector.load %arg1[%9, %c0_7, %c0_8] : memref<6x32x32xbf16, #tpu.memory_space<vmem>>, vector<1x32x32xbf16>
    %11 = vector.shape_cast %10 : vector<1x32x32xbf16> to vector<32x32xbf16>
    %cst_9 = arith.constant dense<0.000000e+00> : vector<32x384xf32>
    %12 = tpu.matmul %11, %0, %cst_9 {dimension_numbers = #tpu.dot_dimension_numbers<[1], [0], [0], [1], [0, 0, 1, 1], [], []>} : vector<32x32xbf16>, vector<32x384xbf16>, vector<32x384xf32> -> vector<32x384xf32>
    %13 = arith.addf %12, %4 : vector<32x384xf32>
    %14 = arith.truncf %8 : vector<32x128xf32> to vector<32x128xbf16>
    %cst_10 = arith.constant dense<0.000000e+00> : vector<32x384xf32>
    %15 = tpu.matmul %14, %1, %cst_10 {dimension_numbers = #tpu.dot_dimension_numbers<[1], [0], [0], [1], [0, 0, 1, 1], [], []>} : vector<32x128xbf16>, vector<128x384xbf16>, vector<32x384xf32> -> vector<32x384xf32>
    %16 = arith.addf %15, %7 : vector<32x384xf32>
    %17 = vector.extract_strided_slice %13 {offsets = [0, 0], sizes = [32, 128], strides = [1, 1]} : vector<32x384xf32> to vector<32x128xf32>
    %18 = vector.extract_strided_slice %16 {offsets = [0, 0], sizes = [32, 128], strides = [1, 1]} : vector<32x384xf32> to vector<32x128xf32>
    %19 = arith.addf %17, %18 : vector<32x128xf32>
    %cst_11 = arith.constant 0.000000e+00 : f32
    %20 = vector.broadcast %cst_11 : f32 to vector<32x128xf32>
    %21 = arith.subf %20, %19 : vector<32x128xf32>
    %22 = math.exp %21 : vector<32x128xf32>
    %cst_12 = arith.constant 1.000000e+00 : f32
    %23 = vector.broadcast %cst_12 : f32 to vector<32x128xf32>
    %24 = arith.addf %23, %22 : vector<32x128xf32>
    %25 = tpu.reciprocal %24 {approx = true} : vector<32x128xf32> -> vector<32x128xf32>
    %26 = vector.extract_strided_slice %13 {offsets = [0, 128], sizes = [32, 128], strides = [1, 1]} : vector<32x384xf32> to vector<32x128xf32>
    %27 = vector.extract_strided_slice %16 {offsets = [0, 128], sizes = [32, 128], strides = [1, 1]} : vector<32x384xf32> to vector<32x128xf32>
    %28 = arith.addf %26, %27 : vector<32x128xf32>
    %cst_13 = arith.constant 0.000000e+00 : f32
    %29 = vector.broadcast %cst_13 : f32 to vector<32x128xf32>
    %30 = arith.subf %29, %28 : vector<32x128xf32>
    %31 = math.exp %30 : vector<32x128xf32>
    %cst_14 = arith.constant 1.000000e+00 : f32
    %32 = vector.broadcast %cst_14 : f32 to vector<32x128xf32>
    %33 = arith.addf %32, %31 : vector<32x128xf32>
    %34 = tpu.reciprocal %33 {approx = true} : vector<32x128xf32> -> vector<32x128xf32>
    %35 = vector.extract_strided_slice %13 {offsets = [0, 256], sizes = [32, 128], strides = [1, 1]} : vector<32x384xf32> to vector<32x128xf32>
    %36 = vector.extract_strided_slice %16 {offsets = [0, 256], sizes = [32, 128], strides = [1, 1]} : vector<32x384xf32> to vector<32x128xf32>
    %37 = arith.mulf %25, %36 : vector<32x128xf32>
    %38 = arith.addf %35, %37 : vector<32x128xf32>
    %39 = math.tanh %38 : vector<32x128xf32>
    %40 = arith.subf %8, %39 : vector<32x128xf32>
    %41 = arith.mulf %34, %40 : vector<32x128xf32>
    %42 = arith.addf %39, %41 : vector<32x128xf32>
    %c1_i32 = arith.constant 1 : i32
    %43 = arith.index_cast %c1_i32 : i32 to index
    %c0_15 = arith.constant 0 : index
    %c0_16 = arith.constant 0 : index
    %44 = vector.load %arg1[%43, %c0_15, %c0_16] : memref<6x32x32xbf16, #tpu.memory_space<vmem>>, vector<1x32x32xbf16>
    %45 = vector.shape_cast %44 : vector<1x32x32xbf16> to vector<32x32xbf16>
    %cst_17 = arith.constant dense<0.000000e+00> : vector<32x384xf32>
    %46 = tpu.matmul %45, %0, %cst_17 {dimension_numbers = #tpu.dot_dimension_numbers<[1], [0], [0], [1], [0, 0, 1, 1], [], []>} : vector<32x32xbf16>, vector<32x384xbf16>, vector<32x384xf32> -> vector<32x384xf32>
    %47 = arith.addf %46, %4 : vector<32x384xf32>
    %48 = arith.truncf %42 : vector<32x128xf32> to vector<32x128xbf16>
    %cst_18 = arith.constant dense<0.000000e+00> : vector<32x384xf32>
    %49 = tpu.matmul %48, %1, %cst_18 {dimension_numbers = #tpu.dot_dimension_numbers<[1], [0], [0], [1], [0, 0, 1, 1], [], []>} : vector<32x128xbf16>, vector<128x384xbf16>, vector<32x384xf32> -> vector<32x384xf32>
    %50 = arith.addf %49, %7 : vector<32x384xf32>
    %51 = vector.extract_strided_slice %47 {offsets = [0, 0], sizes = [32, 128], strides = [1, 1]} : vector<32x384xf32> to vector<32x128xf32>
    %52 = vector.extract_strided_slice %50 {offsets = [0, 0], sizes = [32, 128], strides = [1, 1]} : vector<32x384xf32> to vector<32x128xf32>
    %53 = arith.addf %51, %52 : vector<32x128xf32>
    %cst_19 = arith.constant 0.000000e+00 : f32
    %54 = vector.broadcast %cst_19 : f32 to vector<32x128xf32>
    %55 = arith.subf %54, %53 : vector<32x128xf32>
    %56 = math.exp %55 : vector<32x128xf32>
    %cst_20 = arith.constant 1.000000e+00 : f32
    %57 = vector.broadcast %cst_20 : f32 to vector<32x128xf32>
    %58 = arith.addf %57, %56 : vector<32x128xf32>
    %59 = tpu.reciprocal %58 {approx = true} : vector<32x128xf32> -> vector<32x128xf32>
    %60 = vector.extract_strided_slice %47 {offsets = [0, 128], sizes = [32, 128], strides = [1, 1]} : vector<32x384xf32> to vector<32x128xf32>
    %61 = vector.extract_strided_slice %50 {offsets = [0, 128], sizes = [32, 128], strides = [1, 1]} : vector<32x384xf32> to vector<32x128xf32>
    %62 = arith.addf %60, %61 : vector<32x128xf32>
    %cst_21 = arith.constant 0.000000e+00 : f32
    %63 = vector.broadcast %cst_21 : f32 to vector<32x128xf32>
    %64 = arith.subf %63, %62 : vector<32x128xf32>
    %65 = math.exp %64 : vector<32x128xf32>
    %cst_22 = arith.constant 1.000000e+00 : f32
    %66 = vector.broadcast %cst_22 : f32 to vector<32x128xf32>
    %67 = arith.addf %66, %65 : vector<32x128xf32>
    %68 = tpu.reciprocal %67 {approx = true} : vector<32x128xf32> -> vector<32x128xf32>
    %69 = vector.extract_strided_slice %47 {offsets = [0, 256], sizes = [32, 128], strides = [1, 1]} : vector<32x384xf32> to vector<32x128xf32>
    %70 = vector.extract_strided_slice %50 {offsets = [0, 256], sizes = [32, 128], strides = [1, 1]} : vector<32x384xf32> to vector<32x128xf32>
    %71 = arith.mulf %59, %70 : vector<32x128xf32>
    %72 = arith.addf %69, %71 : vector<32x128xf32>
    %73 = math.tanh %72 : vector<32x128xf32>
    %74 = arith.subf %42, %73 : vector<32x128xf32>
    %75 = arith.mulf %68, %74 : vector<32x128xf32>
    %76 = arith.addf %73, %75 : vector<32x128xf32>
    %c2_i32 = arith.constant 2 : i32
    %77 = arith.index_cast %c2_i32 : i32 to index
    %c0_23 = arith.constant 0 : index
    %c0_24 = arith.constant 0 : index
    %78 = vector.load %arg1[%77, %c0_23, %c0_24] : memref<6x32x32xbf16, #tpu.memory_space<vmem>>, vector<1x32x32xbf16>
    %79 = vector.shape_cast %78 : vector<1x32x32xbf16> to vector<32x32xbf16>
    %cst_25 = arith.constant dense<0.000000e+00> : vector<32x384xf32>
    %80 = tpu.matmul %79, %0, %cst_25 {dimension_numbers = #tpu.dot_dimension_numbers<[1], [0], [0], [1], [0, 0, 1, 1], [], []>} : vector<32x32xbf16>, vector<32x384xbf16>, vector<32x384xf32> -> vector<32x384xf32>
    %81 = arith.addf %80, %4 : vector<32x384xf32>
    %82 = arith.truncf %76 : vector<32x128xf32> to vector<32x128xbf16>
    %cst_26 = arith.constant dense<0.000000e+00> : vector<32x384xf32>
    %83 = tpu.matmul %82, %1, %cst_26 {dimension_numbers = #tpu.dot_dimension_numbers<[1], [0], [0], [1], [0, 0, 1, 1], [], []>} : vector<32x128xbf16>, vector<128x384xbf16>, vector<32x384xf32> -> vector<32x384xf32>
    %84 = arith.addf %83, %7 : vector<32x384xf32>
    %85 = vector.extract_strided_slice %81 {offsets = [0, 0], sizes = [32, 128], strides = [1, 1]} : vector<32x384xf32> to vector<32x128xf32>
    %86 = vector.extract_strided_slice %84 {offsets = [0, 0], sizes = [32, 128], strides = [1, 1]} : vector<32x384xf32> to vector<32x128xf32>
    %87 = arith.addf %85, %86 : vector<32x128xf32>
    %cst_27 = arith.constant 0.000000e+00 : f32
    %88 = vector.broadcast %cst_27 : f32 to vector<32x128xf32>
    %89 = arith.subf %88, %87 : vector<32x128xf32>
    %90 = math.exp %89 : vector<32x128xf32>
    %cst_28 = arith.constant 1.000000e+00 : f32
    %91 = vector.broadcast %cst_28 : f32 to vector<32x128xf32>
    %92 = arith.addf %91, %90 : vector<32x128xf32>
    %93 = tpu.reciprocal %92 {approx = true} : vector<32x128xf32> -> vector<32x128xf32>
    %94 = vector.extract_strided_slice %81 {offsets = [0, 128], sizes = [32, 128], strides = [1, 1]} : vector<32x384xf32> to vector<32x128xf32>
    %95 = vector.extract_strided_slice %84 {offsets = [0, 128], sizes = [32, 128], strides = [1, 1]} : vector<32x384xf32> to vector<32x128xf32>
    %96 = arith.addf %94, %95 : vector<32x128xf32>
    %cst_29 = arith.constant 0.000000e+00 : f32
    %97 = vector.broadcast %cst_29 : f32 to vector<32x128xf32>
    %98 = arith.subf %97, %96 : vector<32x128xf32>
    %99 = math.exp %98 : vector<32x128xf32>
    %cst_30 = arith.constant 1.000000e+00 : f32
    %100 = vector.broadcast %cst_30 : f32 to vector<32x128xf32>
    %101 = arith.addf %100, %99 : vector<32x128xf32>
    %102 = tpu.reciprocal %101 {approx = true} : vector<32x128xf32> -> vector<32x128xf32>
    %103 = vector.extract_strided_slice %81 {offsets = [0, 256], sizes = [32, 128], strides = [1, 1]} : vector<32x384xf32> to vector<32x128xf32>
    %104 = vector.extract_strided_slice %84 {offsets = [0, 256], sizes = [32, 128], strides = [1, 1]} : vector<32x384xf32> to vector<32x128xf32>
    %105 = arith.mulf %93, %104 : vector<32x128xf32>
    %106 = arith.addf %103, %105 : vector<32x128xf32>
    %107 = math.tanh %106 : vector<32x128xf32>
    %108 = arith.subf %76, %107 : vector<32x128xf32>
    %109 = arith.mulf %102, %108 : vector<32x128xf32>
    %110 = arith.addf %107, %109 : vector<32x128xf32>
    %c3_i32 = arith.constant 3 : i32
    %111 = arith.index_cast %c3_i32 : i32 to index
    %c0_31 = arith.constant 0 : index
    %c0_32 = arith.constant 0 : index
    %112 = vector.load %arg1[%111, %c0_31, %c0_32] : memref<6x32x32xbf16, #tpu.memory_space<vmem>>, vector<1x32x32xbf16>
    %113 = vector.shape_cast %112 : vector<1x32x32xbf16> to vector<32x32xbf16>
    %cst_33 = arith.constant dense<0.000000e+00> : vector<32x384xf32>
    %114 = tpu.matmul %113, %0, %cst_33 {dimension_numbers = #tpu.dot_dimension_numbers<[1], [0], [0], [1], [0, 0, 1, 1], [], []>} : vector<32x32xbf16>, vector<32x384xbf16>, vector<32x384xf32> -> vector<32x384xf32>
    %115 = arith.addf %114, %4 : vector<32x384xf32>
    %116 = arith.truncf %110 : vector<32x128xf32> to vector<32x128xbf16>
    %cst_34 = arith.constant dense<0.000000e+00> : vector<32x384xf32>
    %117 = tpu.matmul %116, %1, %cst_34 {dimension_numbers = #tpu.dot_dimension_numbers<[1], [0], [0], [1], [0, 0, 1, 1], [], []>} : vector<32x128xbf16>, vector<128x384xbf16>, vector<32x384xf32> -> vector<32x384xf32>
    %118 = arith.addf %117, %7 : vector<32x384xf32>
    %119 = vector.extract_strided_slice %115 {offsets = [0, 0], sizes = [32, 128], strides = [1, 1]} : vector<32x384xf32> to vector<32x128xf32>
    %120 = vector.extract_strided_slice %118 {offsets = [0, 0], sizes = [32, 128], strides = [1, 1]} : vector<32x384xf32> to vector<32x128xf32>
    %121 = arith.addf %119, %120 : vector<32x128xf32>
    %cst_35 = arith.constant 0.000000e+00 : f32
    %122 = vector.broadcast %cst_35 : f32 to vector<32x128xf32>
    %123 = arith.subf %122, %121 : vector<32x128xf32>
    %124 = math.exp %123 : vector<32x128xf32>
    %cst_36 = arith.constant 1.000000e+00 : f32
    %125 = vector.broadcast %cst_36 : f32 to vector<32x128xf32>
    %126 = arith.addf %125, %124 : vector<32x128xf32>
    %127 = tpu.reciprocal %126 {approx = true} : vector<32x128xf32> -> vector<32x128xf32>
    %128 = vector.extract_strided_slice %115 {offsets = [0, 128], sizes = [32, 128], strides = [1, 1]} : vector<32x384xf32> to vector<32x128xf32>
    %129 = vector.extract_strided_slice %118 {offsets = [0, 128], sizes = [32, 128], strides = [1, 1]} : vector<32x384xf32> to vector<32x128xf32>
    %130 = arith.addf %128, %129 : vector<32x128xf32>
    %cst_37 = arith.constant 0.000000e+00 : f32
    %131 = vector.broadcast %cst_37 : f32 to vector<32x128xf32>
    %132 = arith.subf %131, %130 : vector<32x128xf32>
    %133 = math.exp %132 : vector<32x128xf32>
    %cst_38 = arith.constant 1.000000e+00 : f32
    %134 = vector.broadcast %cst_38 : f32 to vector<32x128xf32>
    %135 = arith.addf %134, %133 : vector<32x128xf32>
    %136 = tpu.reciprocal %135 {approx = true} : vector<32x128xf32> -> vector<32x128xf32>
    %137 = vector.extract_strided_slice %115 {offsets = [0, 256], sizes = [32, 128], strides = [1, 1]} : vector<32x384xf32> to vector<32x128xf32>
    %138 = vector.extract_strided_slice %118 {offsets = [0, 256], sizes = [32, 128], strides = [1, 1]} : vector<32x384xf32> to vector<32x128xf32>
    %139 = arith.mulf %127, %138 : vector<32x128xf32>
    %140 = arith.addf %137, %139 : vector<32x128xf32>
    %141 = math.tanh %140 : vector<32x128xf32>
    %142 = arith.subf %110, %141 : vector<32x128xf32>
    %143 = arith.mulf %136, %142 : vector<32x128xf32>
    %144 = arith.addf %141, %143 : vector<32x128xf32>
    %c4_i32 = arith.constant 4 : i32
    %145 = arith.index_cast %c4_i32 : i32 to index
    %c0_39 = arith.constant 0 : index
    %c0_40 = arith.constant 0 : index
    %146 = vector.load %arg1[%145, %c0_39, %c0_40] : memref<6x32x32xbf16, #tpu.memory_space<vmem>>, vector<1x32x32xbf16>
    %147 = vector.shape_cast %146 : vector<1x32x32xbf16> to vector<32x32xbf16>
    %cst_41 = arith.constant dense<0.000000e+00> : vector<32x384xf32>
    %148 = tpu.matmul %147, %0, %cst_41 {dimension_numbers = #tpu.dot_dimension_numbers<[1], [0], [0], [1], [0, 0, 1, 1], [], []>} : vector<32x32xbf16>, vector<32x384xbf16>, vector<32x384xf32> -> vector<32x384xf32>
    %149 = arith.addf %148, %4 : vector<32x384xf32>
    %150 = arith.truncf %144 : vector<32x128xf32> to vector<32x128xbf16>
    %cst_42 = arith.constant dense<0.000000e+00> : vector<32x384xf32>
    %151 = tpu.matmul %150, %1, %cst_42 {dimension_numbers = #tpu.dot_dimension_numbers<[1], [0], [0], [1], [0, 0, 1, 1], [], []>} : vector<32x128xbf16>, vector<128x384xbf16>, vector<32x384xf32> -> vector<32x384xf32>
    %152 = arith.addf %151, %7 : vector<32x384xf32>
    %153 = vector.extract_strided_slice %149 {offsets = [0, 0], sizes = [32, 128], strides = [1, 1]} : vector<32x384xf32> to vector<32x128xf32>
    %154 = vector.extract_strided_slice %152 {offsets = [0, 0], sizes = [32, 128], strides = [1, 1]} : vector<32x384xf32> to vector<32x128xf32>
    %155 = arith.addf %153, %154 : vector<32x128xf32>
    %cst_43 = arith.constant 0.000000e+00 : f32
    %156 = vector.broadcast %cst_43 : f32 to vector<32x128xf32>
    %157 = arith.subf %156, %155 : vector<32x128xf32>
    %158 = math.exp %157 : vector<32x128xf32>
    %cst_44 = arith.constant 1.000000e+00 : f32
    %159 = vector.broadcast %cst_44 : f32 to vector<32x128xf32>
    %160 = arith.addf %159, %158 : vector<32x128xf32>
    %161 = tpu.reciprocal %160 {approx = true} : vector<32x128xf32> -> vector<32x128xf32>
    %162 = vector.extract_strided_slice %149 {offsets = [0, 128], sizes = [32, 128], strides = [1, 1]} : vector<32x384xf32> to vector<32x128xf32>
    %163 = vector.extract_strided_slice %152 {offsets = [0, 128], sizes = [32, 128], strides = [1, 1]} : vector<32x384xf32> to vector<32x128xf32>
    %164 = arith.addf %162, %163 : vector<32x128xf32>
    %cst_45 = arith.constant 0.000000e+00 : f32
    %165 = vector.broadcast %cst_45 : f32 to vector<32x128xf32>
    %166 = arith.subf %165, %164 : vector<32x128xf32>
    %167 = math.exp %166 : vector<32x128xf32>
    %cst_46 = arith.constant 1.000000e+00 : f32
    %168 = vector.broadcast %cst_46 : f32 to vector<32x128xf32>
    %169 = arith.addf %168, %167 : vector<32x128xf32>
    %170 = tpu.reciprocal %169 {approx = true} : vector<32x128xf32> -> vector<32x128xf32>
    %171 = vector.extract_strided_slice %149 {offsets = [0, 256], sizes = [32, 128], strides = [1, 1]} : vector<32x384xf32> to vector<32x128xf32>
    %172 = vector.extract_strided_slice %152 {offsets = [0, 256], sizes = [32, 128], strides = [1, 1]} : vector<32x384xf32> to vector<32x128xf32>
    %173 = arith.mulf %161, %172 : vector<32x128xf32>
    %174 = arith.addf %171, %173 : vector<32x128xf32>
    %175 = math.tanh %174 : vector<32x128xf32>
    %176 = arith.subf %144, %175 : vector<32x128xf32>
    %177 = arith.mulf %170, %176 : vector<32x128xf32>
    %178 = arith.addf %175, %177 : vector<32x128xf32>
    %c5_i32 = arith.constant 5 : i32
    %179 = arith.index_cast %c5_i32 : i32 to index
    %c0_47 = arith.constant 0 : index
    %c0_48 = arith.constant 0 : index
    %180 = vector.load %arg1[%179, %c0_47, %c0_48] : memref<6x32x32xbf16, #tpu.memory_space<vmem>>, vector<1x32x32xbf16>
    %181 = vector.shape_cast %180 : vector<1x32x32xbf16> to vector<32x32xbf16>
    %cst_49 = arith.constant dense<0.000000e+00> : vector<32x384xf32>
    %182 = tpu.matmul %181, %0, %cst_49 {dimension_numbers = #tpu.dot_dimension_numbers<[1], [0], [0], [1], [0, 0, 1, 1], [], []>} : vector<32x32xbf16>, vector<32x384xbf16>, vector<32x384xf32> -> vector<32x384xf32>
    %183 = arith.addf %182, %4 : vector<32x384xf32>
    %184 = arith.truncf %178 : vector<32x128xf32> to vector<32x128xbf16>
    %cst_50 = arith.constant dense<0.000000e+00> : vector<32x384xf32>
    %185 = tpu.matmul %184, %1, %cst_50 {dimension_numbers = #tpu.dot_dimension_numbers<[1], [0], [0], [1], [0, 0, 1, 1], [], []>} : vector<32x128xbf16>, vector<128x384xbf16>, vector<32x384xf32> -> vector<32x384xf32>
    %186 = arith.addf %185, %7 : vector<32x384xf32>
    %187 = vector.extract_strided_slice %183 {offsets = [0, 0], sizes = [32, 128], strides = [1, 1]} : vector<32x384xf32> to vector<32x128xf32>
    %188 = vector.extract_strided_slice %186 {offsets = [0, 0], sizes = [32, 128], strides = [1, 1]} : vector<32x384xf32> to vector<32x128xf32>
    %189 = arith.addf %187, %188 : vector<32x128xf32>
    %cst_51 = arith.constant 0.000000e+00 : f32
    %190 = vector.broadcast %cst_51 : f32 to vector<32x128xf32>
    %191 = arith.subf %190, %189 : vector<32x128xf32>
    %192 = math.exp %191 : vector<32x128xf32>
    %cst_52 = arith.constant 1.000000e+00 : f32
    %193 = vector.broadcast %cst_52 : f32 to vector<32x128xf32>
    %194 = arith.addf %193, %192 : vector<32x128xf32>
    %195 = tpu.reciprocal %194 {approx = true} : vector<32x128xf32> -> vector<32x128xf32>
    %196 = vector.extract_strided_slice %183 {offsets = [0, 128], sizes = [32, 128], strides = [1, 1]} : vector<32x384xf32> to vector<32x128xf32>
    %197 = vector.extract_strided_slice %186 {offsets = [0, 128], sizes = [32, 128], strides = [1, 1]} : vector<32x384xf32> to vector<32x128xf32>
    %198 = arith.addf %196, %197 : vector<32x128xf32>
    %cst_53 = arith.constant 0.000000e+00 : f32
    %199 = vector.broadcast %cst_53 : f32 to vector<32x128xf32>
    %200 = arith.subf %199, %198 : vector<32x128xf32>
    %201 = math.exp %200 : vector<32x128xf32>
    %cst_54 = arith.constant 1.000000e+00 : f32
    %202 = vector.broadcast %cst_54 : f32 to vector<32x128xf32>
    %203 = arith.addf %202, %201 : vector<32x128xf32>
    %204 = tpu.reciprocal %203 {approx = true} : vector<32x128xf32> -> vector<32x128xf32>
    %205 = vector.extract_strided_slice %183 {offsets = [0, 256], sizes = [32, 128], strides = [1, 1]} : vector<32x384xf32> to vector<32x128xf32>
    %206 = vector.extract_strided_slice %186 {offsets = [0, 256], sizes = [32, 128], strides = [1, 1]} : vector<32x384xf32> to vector<32x128xf32>
    %207 = arith.mulf %195, %206 : vector<32x128xf32>
    %208 = arith.addf %205, %207 : vector<32x128xf32>
    %209 = math.tanh %208 : vector<32x128xf32>
    %210 = arith.subf %178, %209 : vector<32x128xf32>
    %211 = arith.mulf %204, %210 : vector<32x128xf32>
    %212 = arith.addf %209, %211 : vector<32x128xf32>
    %c6_i32 = arith.constant 6 : i32
    %213 = arith.truncf %212 : vector<32x128xf32> to vector<32x128xbf16>
    %c0_55 = arith.constant 0 : index
    %c0_56 = arith.constant 0 : index
    %214 = vector.load %arg6[%c0_55, %c0_56] : memref<128x128xbf16, #tpu.memory_space<vmem>>, vector<128x128xbf16>
    %cst_57 = arith.constant dense<0.000000e+00> : vector<32x128xf32>
    %215 = tpu.matmul %213, %214, %cst_57 {dimension_numbers = #tpu.dot_dimension_numbers<[1], [0], [0], [1], [0, 0, 1, 1], [], []>} : vector<32x128xbf16>, vector<128x128xbf16>, vector<32x128xf32> -> vector<32x128xf32>
    %c0_58 = arith.constant 0 : index
    %c0_59 = arith.constant 0 : index
    %216 = vector.load %arg7[%c0_58, %c0_59] : memref<1x128xf32, #tpu.memory_space<vmem>>, vector<1x128xf32>
    %217 = vector.broadcast %216 : vector<1x128xf32> to vector<32x128xf32>
    %218 = arith.addf %215, %217 : vector<32x128xf32>
    %c0_60 = arith.constant 0 : index
    %c0_61 = arith.constant 0 : index
    %219 = vector.load %arg8[%c0_60, %c0_61] : memref<32x128xf32, #tpu.memory_space<vmem>>, vector<32x128xf32>
    tpu.vector_store %arg8[%c0_60, %c0_61], %218 {strides = array<i32>} : memref<32x128xf32, #tpu.memory_space<vmem>>, vector<32x128xf32>,
    return
  }
  func.func @transform_0(%arg0: i32) -> (i32, i32, i32) {
    %c0_i32 = arith.constant 0 : i32
    %c0_i32_0 = arith.constant 0 : i32
    %c0_i32_1 = arith.constant 0 : i32
    return %c0_i32, %arg0, %c0_i32_0 : i32, i32, i32
  }
  func.func @transform_1(%arg0: i32) -> (i32, i32) {
    %c0_i32 = arith.constant 0 : i32
    %c0_i32_0 = arith.constant 0 : i32
    %c0_i32_1 = arith.constant 0 : i32
    return %c0_i32, %c0_i32_0 : i32, i32
  }
  func.func @transform_2(%arg0: i32) -> (i32, i32) {
    %c0_i32 = arith.constant 0 : i32
    %c0_i32_0 = arith.constant 0 : i32
    %c0_i32_1 = arith.constant 0 : i32
    return %c0_i32, %c0_i32_0 : i32, i32
  }
  func.func @transform_3(%arg0: i32) -> (i32, i32) {
    %c0_i32 = arith.constant 0 : i32
    %c0_i32_0 = arith.constant 0 : i32
    %c0_i32_1 = arith.constant 0 : i32
    return %c0_i32, %c0_i32_0 : i32, i32
  }
  func.func @transform_4(%arg0: i32) -> (i32, i32) {
    %c0_i32 = arith.constant 0 : i32
    %c0_i32_0 = arith.constant 0 : i32
    %c0_i32_1 = arith.constant 0 : i32
    return %c0_i32, %c0_i32_0 : i32, i32
  }
  func.func @transform_5(%arg0: i32) -> (i32, i32) {
    %c0_i32 = arith.constant 0 : i32
    %c0_i32_0 = arith.constant 0 : i32
    %c0_i32_1 = arith.constant 0 : i32
    return %c0_i32, %c0_i32_0 : i32, i32
  }
  func.func @transform_6(%arg0: i32) -> (i32, i32) {
    %c0_i32 = arith.constant 0 : i32
    %c0_i32_0 = arith.constant 0 : i32
    %c0_i32_1 = arith.constant 0 : i32
    return %c0_i32, %c0_i32_0 : i32, i32
  }
  func.func @transform_7(%arg0: i32) -> (i32, i32) {
    %c0_i32 = arith.constant 0 : i32
    %c0_i32_0 = arith.constant 0 : i32
    return %arg0, %c0_i32 : i32, i32
  }
}

</mosaic_0001>

<bundles_post_ra>
// kernel: tpu_custom_call.1
= control target key start
LH: loop header
LB: loop body
LE: loop exit
PB: predicated region body
PF: predicated region fallthrough
CT: control target
= control target key end

     0   :  { %12 = vsyncpa [#allocation3], 0  ;;  %s4037_s0 = inlined_call_operand.hbm [shape: bf16[6,32,32], index: 0, kind: input, shape index: {}]   ;;  %s4038_s1 = inlined_call_operand.hbm [shape: bf16[32,384], index: 1, kind: input, shape index: {}]   ;;  %s4039_s2 = inlined_call_operand.hbm [shape: bf16[128,384], index: 2, kind: input, shape index: {}]   ;;  %s4040_s3 = inlined_call_operand.vmem [shape: f32[1,384], index: 3, kind: input, shape index: {}]   ;;  %s4041_s4 = inlined_call_operand.vmem [shape: f32[1,384], index: 4, kind: input, shape index: {}]   ;;  %s4042_s5 = inlined_call_operand.hbm [shape: bf16[128,128], index: 5, kind: input, shape index: {}]   ;;  %s4043_s6 = inlined_call_operand.vmem [shape: f32[1,128], index: 6, kind: input, shape index: {}]   ;;  %s4044_s7 = inlined_call_operand.hbm [shape: f32[32,128], index: 7, kind: output, shape index: {}]  }
   0x1   :  { %13 = vsyncpa [#allocation6], 0 }
   0x2   :  { %14 = vsyncpa [#allocation9], 0 }
   0x3   :  { %15 = vsyncpa [#allocation4], 0  ;;  %s3215_s24 = smov [#allocation5]   ;;  %s3097_s28 = scalar_lea.hbm %s4038_s1, 768 }
   0x4   :  { %s33_s25 = sshll.u32 %s3215_s24, 4  ;;  %p3098_p0 = scmp.ne.s32.totalorder %s4038_s1, %s3097_s28  ;;  %s34_s25 = int_to_ptr.vmem [resolvable:$true] %s33_s25 }
   0x5   :  { %p3101_p1 = scmp.lt.u32.totalorder %s3097_s28, %s4038_s1 }
   0x7   :  { %p3103_p2 = pnand %p3101_p1, %p3098_p0 }
   0x9   :  { %3106 = shalt.err (!%p3103_p2)
}
   0xa   :  { %s3107_s10 = scalar_lea.vmem %s34_s25, 768  ;;  %p3112_p4 = scmp.lt.s32.totalorder %s34_s25, %s34_s25 }
   0xb   :  { %p3108_p3 = scmp.ne.s32.totalorder %s34_s25, %s3107_s10  ;;  %p3113_p5 = scmp.lt.s32.totalorder %s3107_s10, %s3107_s10 }
   0xd   :  { %p3114_p6 = por %p3113_p5, %p3112_p4 }
   0xf   :  { %p3115_p7 = pnand %p3114_p6, %p3108_p3 }
  0x11   :  { %3118 = shalt.err (!%p3115_p7)
}
  0x12   :  { %s3216_s11 = smov 192   ;;  %s3217_s12 = smov 12  }
  0x13   :  { %39 = dma.hbm_to_vmem [thread:$0]  %s4038_s1, 768, %s34_s25, [#allocation6], %s3216_s11, %s3216_s11, %s3217_s12  }
  0x14   :  { %s3218_s15 = smov [#allocation2]   ;;  %s3119_s19 = scalar_lea.hbm %s4037_s0, 1536 }
  0x15   :  { %s21_s16 = sshll.u32 %s3218_s15, 4  ;;  %p3120_p8 = scmp.ne.s32.totalorder %s4037_s0, %s3119_s19  ;;  %s22_s16 = int_to_ptr.vmem [resolvable:$true] %s21_s16 }
  0x16   :  { %p3123_p9 = scmp.lt.u32.totalorder %s3119_s19, %s4037_s0 }
  0x18   :  { %p3125_p10 = pnand %p3123_p9, %p3120_p8 }
  0x1a   :  { %3128 = shalt.err (!%p3125_p10)
}
  0x1b   :  { %s3129_s24 = scalar_lea.vmem %s22_s16, 1536  ;;  %p3134_p12 = scmp.lt.s32.totalorder %s22_s16, %s22_s16 }
  0x1c   :  { %p3130_p11 = scmp.ne.s32.totalorder %s22_s16, %s3129_s24  ;;  %p3135_p13 = scmp.lt.s32.totalorder %s3129_s24, %s3129_s24 }
  0x1e   :  { %p3136_p0 = por %p3135_p13, %p3134_p12 }
  0x20   :  { %p3137_p1 = pnand %p3136_p0, %p3130_p11 }
  0x22   :  { %3140 = shalt.err (!%p3137_p1)
}
  0x23   :  { %s3219_s1 = smov 64   ;;  %s3220_s25 = smov 4  }
  0x24   :  { %27 = dma.hbm_to_vmem [thread:$0]  %s4037_s0, 1536, %s22_s16, [#allocation3], %s3219_s1, %s3219_s1, %s3220_s25  }
  0x25   :  { %s3221_s28 = smov [#allocation7]   ;;  %s3222_s30 = smov [#allocation8]  }
  0x26   :  { %s45_s29 = sshll.u32 %s3221_s28, 4  ;;  %s61_s8 = sshll.u32 %s3222_s30, 4  ;;  %s46_s29 = int_to_ptr.vmem [resolvable:$true] %s45_s29  ;;  %s3297_s8 = int_to_ptr.vmem [resolvable:$true] %s61_s8 }
  0x27   :  { %s3141_s13 = scalar_lea.hbm %s4039_s2, 3072 }
  0x28   :  { %p3142_p2 = scmp.ne.s32.totalorder %s4039_s2, %s3141_s13  ;;  %p3145_p3 = scmp.lt.u32.totalorder %s3141_s13, %s4039_s2 }
  0x2a   :  { %p3147_p4 = pnand %p3145_p3, %p3142_p2 }
  0x2c   :  { %3150 = shalt.err (!%p3147_p4)
}
  0x2d   :  { %s3151_s0 = scalar_lea.vmem %s46_s29, 3072  ;;  %p3156_p6 = scmp.lt.s32.totalorder %s46_s29, %s46_s29 }
  0x2e   :  { %p3152_p5 = scmp.ne.s32.totalorder %s46_s29, %s3151_s0  ;;  %p3157_p7 = scmp.lt.s32.totalorder %s3151_s0, %s3151_s0 }
  0x30   :  { %p3158_p8 = por %p3157_p7, %p3156_p6 }
  0x32   :  { %p3159_p9 = pnand %p3158_p8, %p3152_p5 }
  0x34   :  { %3162 = shalt.err (!%p3159_p9)
}
  0x35   :  { %51 = dma.hbm_to_vmem [thread:$0]  %s4039_s2, 3072, %s46_s29, [#allocation6], %s3216_s11, %s3216_s11, %s3217_s12  }
  0x36   :  { %s3163_s22 = scalar_lea.hbm %s4042_s5, 1024 }
  0x37   :  { %p3164_p10 = scmp.ne.s32.totalorder %s4042_s5, %s3163_s22  ;;  %p3167_p11 = scmp.lt.u32.totalorder %s3163_s22, %s4042_s5 }
  0x39   :  { %p3169_p12 = pnand %p3167_p11, %p3164_p10 }
  0x3b   :  { %3172 = shalt.err (!%p3169_p12)
}
  0x3c   :  { %s3173_s28 = scalar_lea.vmem %s3297_s8, 1024  ;;  %p3178_p0 = scmp.lt.s32.totalorder %s3297_s8, %s3297_s8 }
  0x3d   :  { %p3174_p13 = scmp.ne.s32.totalorder %s3297_s8, %s3173_s28  ;;  %p3179_p1 = scmp.lt.s32.totalorder %s3173_s28, %s3173_s28 }
  0x3f   :  { %p3180_p2 = por %p3179_p1, %p3178_p0 }
  0x41   :  { %p3181_p3 = pnand %p3180_p2, %p3174_p13 }
  0x43   :  { %3184 = shalt.err (!%p3181_p3)
}
  0x44   :  { %67 = dma.hbm_to_vmem [thread:$0]  %s4042_s5, 1024, %s3297_s8, [#allocation9], %s3219_s1, %s3219_s1, %s3220_s25  }
  0x45   :  { %3207 = dma.done.wait [#allocation3], 1536  }
  0x46   :  { %3208 = vsyncadd [#allocation3], 4294965760 }
  0x47   :  { %3209 = dma.done.wait [#allocation6], 3840  }
  0x48   :  { %3210 = vsyncadd [#allocation6], 4294963456 }
  0x49   :  { %3211 = dma.done.wait [#allocation9], 1024  }
  0x4a   :  { %3212 = vsyncadd [#allocation9], 4294966272  ;;  %v4045_v0 = vmov 0   ;;  %v3336_v1 = vld [vmem:[#allocation5 + $0x4] ss:$12 sps:$4 sm:$0xff]   ;;  %vm203_vm0 = vcmask 261120   ;;  %v125_v39 = vlaneseq }
  0x4b   :  { %242 = vmatprep.mubr.bf16.mxu0 %v4045_v0  ;;  %2447 = vmatprep.mubr.bf16.mxu1 %v4045_v0  ;;  %v3338_v2 = vld [vmem:[#allocation5] ss:$12 sps:$4 sm:$0xff]   ;;  %v3341_v3 = vld [vmem:[#allocation5 + $0x1c] ss:$12 sps:$4 sm:$0xff]   ;;  %v3344_v4 = vld [vmem:[#allocation5 + $0x18] ss:$12 sps:$4 sm:$0xff]  }
  0x4c   :  { %210 = vmatprep.subr.bf16.mxu0 %v3336_v1  ;;  %v3347_v5 = vld [vmem:[#allocation5 + $0x8] ss:$12 sps:$4 sm:$0xff]   ;;  %v2773_v6 = vld [vmem:[#allocation2] sm:$0xff]   ;;  %v3367_v11 = vld [vmem:[#allocation7 + $0x20] ss:$12 sps:$4 sm:$0xff]   ;;  %v3503_v40 = vshrl.u32 %v125_v39, 7 }
  0x4d   :  { %211 = vmatpush1.bf16.msra.mxu0 %v3338_v2  ;;  %v3351_v7 = vld [vmem:[#allocation5 + $0x20] ss:$12 sps:$4 sm:$0xff]   ;;  %v3361_v10 = vld [vmem:[#allocation7 + $0x8] ss:$12 sps:$4 sm:$0xff]   ;;  %v3369_v12 = vld [vmem:[#allocation7 + $0x38] ss:$12 sps:$4 sm:$0xff]  }
  0x4e   :  { %212 = vmatprep.subr.bf16.mxu0 %v3341_v3  ;;  %v3357_v8 = vld [vmem:[#allocation7 + $0x4] ss:$12 sps:$4 sm:$0xff]   ;;  %v2775_v9 = vld [vmem:[#allocation2 + $0x8] sm:$0xff]   ;;  %2431 = vmatprep.subr.bf16.mxu1 %v3361_v10  ;;  %v3372_v13 = vld [vmem:[#allocation7] ss:$12 sps:$4 sm:$0xff]   ;;  %v127_v41 = vsub.s32 0, %v3503_v40 }
  0x4f   :  { %2432 = vmatpush3.bf16.msra.mxu1 %v3361_v10  ;;  %v3375_v14 = vld [vmem:[#allocation7 + $0x1c] ss:$12 sps:$4 sm:$0xff]   ;;  %v3378_v15 = vld [vmem:[#allocation7 + $0x18] ss:$12 sps:$4 sm:$0xff]   ;;  %v3383_v17 = vld [vmem:[#allocation7 + $0x34] ss:$12 sps:$4 sm:$0xff]  }
  0x50   :  { %2433 = vmatprep.subr.bf16.mxu1 %v3367_v11  ;;  %v3380_v16 = vld [vmem:[#allocation7 + $0x50] ss:$12 sps:$4 sm:$0xff]   ;;  %v3387_v18 = vld [vmem:[#allocation7 + $0x68] ss:$12 sps:$4 sm:$0xff]   ;;  %v3394_v20 = vld [vmem:[#allocation7 + $0x4c] ss:$12 sps:$4 sm:$0xff]  }
  0x51   :  { %213 = vmatpush1.bf16.msra.mxu0 %v3344_v4  ;;  %v3391_v19 = vld [vmem:[#allocation7 + $0x30] ss:$12 sps:$4 sm:$0xff]   ;;  %v3397_v21 = vld [vmem:[#allocation7 + $0x80] ss:$12 sps:$4 sm:$0xff]   ;;  %v3401_v22 = vld [vmem:[#allocation7 + $0x48] ss:$12 sps:$4 sm:$0xff]  }
  0x52   :  { %2423 = vmatprep.subr.bf16.mxu0 %v3347_v5  ;;  %v3404_v23 = vld [vmem:[#allocation7 + $0x64] ss:$12 sps:$4 sm:$0xff]   ;;  %v3413_v25 = vld [vmem:[#allocation7 + $0x60] ss:$12 sps:$4 sm:$0xff]   ;;  %v3416_v26 = vld [vmem:[#allocation7 + $0x7c] ss:$12 sps:$4 sm:$0xff]  }
  0x53   :  { %2434 = vmatpush3.bf16.msra.mxu1 %v3367_v11  ;;  %v3410_v24 = vld [vmem:[#allocation7 + $0x98] ss:$12 sps:$4 sm:$0xff]   ;;  %v3420_v27 = vld [vmem:[#allocation7 + $0xb0] ss:$12 sps:$4 sm:$0xff]   ;;  %v3426_v29 = vld [vmem:[#allocation7 + $0x94] ss:$12 sps:$4 sm:$0xff]  }
  0x54   :  { %2262 = vmatmul.mubr.msk.bf16.vlgmr.msra.gmra.mrb[0].mxu0 %vm203_vm0, %v2773_v6  ;;  %2435 = vmatprep.subr.bf16.mxu1 %v3369_v12  ;;  %v3423_v28 = vld [vmem:[#allocation7 + $0x78] ss:$12 sps:$4 sm:$0xff]   ;;  %v3431_v30 = vld [vmem:[#allocation7 + $0x90] ss:$12 sps:$4 sm:$0xff]   ;;  %v3439_v32 = vld [vmem:[#allocation7 + $0xa8] ss:$12 sps:$4 sm:$0xff]  }
  0x55   :  { %2424 = vmatpush3.bf16.msra.mxu0 %v3347_v5  ;;  %252 = vmatprep.mubr.bf16.mxu0 %v4045_v0  ;;  %v3434_v31 = vld [vmem:[#allocation7 + $0xac] ss:$12 sps:$4 sm:$0xff]   ;;  %v2809_v33 = vld [vmem:[#allocation2 + $0x10] sm:$0xff]   ;;  %v140_v42 = vld [vmem:[%s4041_s4] sm:$0x7]  ;;  %v131_v48 = vsub.s32 1, %v3503_v40 }
  0x56   :  { %2425 = vmatprep.subr.bf16.mxu0 %v3351_v7  ;;  %v2810_v34 = vld [vmem:[#allocation2 + $0x18] sm:$0xff]   ;;  %v123_v43 = vld [vmem:[%s4040_s3] sm:$0x7]  ;;  %v145_v45 = vrot.slane %v140_v42, %v127_v41  ;;  %s3224_s29 = smov [#allocation10]  }
  0x57   :  { %2436 = vmatpush3.bf16.msra.mxu1 %v3369_v12  ;;  %v128_v44 = vrot.slane %v123_v43, %v127_v41  ;;  %v132_v52 = vrot.slane %v123_v43, %v131_v48  ;;  %v149_v53 = vrot.slane %v140_v42, %v131_v48  ;;  %s2240_s30 = sshll.u32 %s3224_s29, 4  ;;  %s2241_s30 = int_to_ptr.vmem [resolvable:$true] %s2240_s30 }
  0x58   :  { %2437 = vmatprep.subr.bf16.mxu1 %v3380_v16  ;;  %s3185_s8 = scalar_lea.vmem %s2241_s30, 512  ;;  %p3190_p5 = scmp.lt.s32.totalorder %s2241_s30, %s2241_s30 }
  0x59   :  { %2426 = vmatpush3.bf16.msra.mxu0 %v3351_v7  ;;  %v3519_v51 = vadd.f32 %v145_v45, %v128_v44  ;;  %v3522_v59 = vadd.f32 %v149_v53, %v132_v52  ;;  %p3186_p4 = scmp.ne.s32.totalorder %s2241_s30, %s3185_s8  ;;  %p3191_p6 = scmp.lt.s32.totalorder %s3185_s8, %s3185_s8 }
  0x5a   :  { %440 = vmatprep.subr.bf16.mxu0 %v3357_v8 }
  0x5b   :  { %2438 = vmatpush3.bf16.msra.mxu1 %v3380_v16  ;;  %p3192_p7 = por %p3191_p6, %p3190_p5 }
  0x5c   :  { %2263 = vmatmul.mubr.msk.bf16.gmra.mrb[4].mxu0 %vm203_vm0, %v2775_v9  ;;  %2439 = vmatprep.subr.bf16.mxu1 %v3387_v18 }
  0x5d   :  { %2427 = vmatprep.mubr.msk.bf16.mxu0 %vm203_vm0, %v2773_v6  ;;  %p3193_p8 = pnand %p3192_p7, %p3186_p4 }
  0x5f   :  { %2440 = vmatpush3.bf16.msra.mxu1 %v3387_v18 }
  0x60   :  { %2441 = vmatprep.subr.bf16.mxu1 %v3397_v21 }
  0x63   :  { %2442 = vmatpush3.bf16.msra.mxu1 %v3397_v21 }
  0x64   :  { %2428 = vmatmul.mubr.msk.bf16.vlgmr.msra.gmra.mrb[8].mxu0 %vm203_vm0, %v2775_v9  ;;  %2443 = vmatprep.subr.bf16.mxu1 %v3410_v24 }
  0x65   :  { %441 = vmatpush1.bf16.msra.mxu0 %v3372_v13  ;;  %472 = vmatprep.mubr.bf16.mxu0 %v4045_v0 }
  0x66   :  { %442 = vmatprep.subr.bf16.mxu0 %v3375_v14 }
  0x67   :  { %2444 = vmatpush3.bf16.msra.mxu1 %v3410_v24 }
  0x68   :  { %2445 = vmatprep.subr.bf16.mxu1 %v3420_v27 }
  0x69   :  { %443 = vmatpush1.bf16.msra.mxu0 %v3378_v15 }
  0x6a   :  { %444 = vmatprep.subr.bf16.mxu0 %v3383_v17 }
  0x6b   :  { %2446 = vmatpush3.bf16.msra.mxu1 %v3420_v27 }
  0x6c   :  { %635 = vmatprep.subr.bf16.mxu1 %v3336_v1 }
  0x6d   :  { %445 = vmatpush1.bf16.msra.mxu0 %v3391_v19 }
  0x6e   :  { %446 = vmatprep.subr.bf16.mxu0 %v3394_v20  ;;  %2448 = vmatmul.mubr.bf16.vlgmr.msra.gmra.mrb[0].mxu1 %v4045_v0 }
  0x6f   :  { %636 = vmatpush1.bf16.msra.mxu1 %v3338_v2  ;;  %667 = vmatprep.mubr.bf16.mxu1 %v4045_v0 }
  0x70   :  { %637 = vmatprep.subr.bf16.mxu1 %v3341_v3 }
  0x71   :  { %447 = vmatpush1.bf16.msra.mxu0 %v3401_v22 }
  0x72   :  { %448 = vmatprep.subr.bf16.mxu0 %v3404_v23 }
  0x73   :  { %638 = vmatpush1.bf16.msra.mxu1 %v3344_v4 }
  0x74   :  { %739 = vmatprep.subr.bf16.mxu1 %v3357_v8 }
  0x75   :  { %449 = vmatpush1.bf16.msra.mxu0 %v3413_v25 }
  0x76   :  { %450 = vmatprep.subr.bf16.mxu0 %v3416_v26  ;;  %2292 = vmatmul.mubr.msk.bf16.vlgmr.msra.gmra.mrb[4].mxu1 %vm203_vm0, %v2809_v33 }
  0x77   :  { %740 = vmatpush1.bf16.msra.mxu1 %v3372_v13  ;;  %677 = vmatprep.mubr.bf16.mxu1 %v4045_v0 }
  0x78   :  { %741 = vmatprep.subr.bf16.mxu1 %v3375_v14 }
  0x79   :  { %451 = vmatpush1.bf16.msra.mxu0 %v3423_v28 }
  0x7a   :  { %452 = vmatprep.subr.bf16.mxu0 %v3426_v29 }
  0x7b   :  { %742 = vmatpush1.bf16.msra.mxu1 %v3378_v15 }
  0x7c   :  { %743 = vmatprep.subr.bf16.mxu1 %v3383_v17 }
  0x7d   :  { %453 = vmatpush1.bf16.msra.mxu0 %v3431_v30 }
  0x7e   :  { %454 = vmatprep.subr.bf16.mxu0 %v3434_v31  ;;  %2293 = vmatmul.mubr.msk.bf16.gmra.mrb[8].mxu1 %vm203_vm0, %v2810_v34 }
  0x7f   :  { %744 = vmatpush1.bf16.msra.mxu1 %v3391_v19  ;;  %771 = vmatprep.mubr.bf16.mxu1 %v4045_v0 }
  0x80   :  { %745 = vmatprep.subr.bf16.mxu1 %v3394_v20 }
  0x81   :  { %455 = vmatpush1.bf16.msra.mxu0 %v3439_v32 }
  0x82   :  { %2451 = vmatprep.subr.bf16.mxu0 %v3347_v5 }
  0x83   :  { %746 = vmatpush1.bf16.msra.mxu1 %v3401_v22 }
  0x84   :  { %473 = vmatmul.mubr.bf16.vlgmr.msra.gmra.mrb[0].mxu0 %v4045_v0  ;;  %747 = vmatprep.subr.bf16.mxu1 %v3404_v23 }
  0x85   :  { %482 = vmatprep.mubr.bf16.mxu0 %v4045_v0  ;;  %2452 = vmatpush3.bf16.msra.mxu0 %v3347_v5 }
  0x86   :  { %2453 = vmatprep.subr.bf16.mxu0 %v3351_v7 }
  0x87   :  { %748 = vmatpush1.bf16.msra.mxu1 %v3413_v25 }
  0x88   :  { %749 = vmatprep.subr.bf16.mxu1 %v3416_v26 }
  0x89   :  { %2454 = vmatpush3.bf16.msra.mxu0 %v3351_v7 }
  0x8a   :  { %2459 = vmatprep.subr.bf16.mxu0 %v3361_v10 }
  0x8b   :  { %750 = vmatpush1.bf16.msra.mxu1 %v3423_v28 }
  0x8c   :  { %483 = vmatmul.mubr.bf16.gmra.mrb[4].mxu0 %v4045_v0  ;;  %751 = vmatprep.subr.bf16.mxu1 %v3426_v29 }
  0x8d   :  { %2455 = vmatprep.mubr.msk.bf16.mxu0 %vm203_vm0, %v2809_v33 }
  0x8f   :  { %752 = vmatpush1.bf16.msra.mxu1 %v3431_v30 }
  0x90   :  { %753 = vmatprep.subr.bf16.mxu1 %v3434_v31 }
  0x93   :  { %754 = vmatpush1.bf16.msra.mxu1 %v3439_v32 }
  0x94   :  { %2456 = vmatmul.mubr.msk.bf16.vlgmr.msra.gmra.mrb[12].mxu0 %vm203_vm0, %v2810_v34  ;;  %2479 = vmatprep.subr.bf16.mxu1 %v3347_v5 }
  0x95   :  { %2460 = vmatpush3.bf16.msra.mxu0 %v3361_v10 }
  0x96   :  { %2461 = vmatprep.subr.bf16.mxu0 %v3367_v11 }
  0x99   :  { %2462 = vmatpush3.bf16.msra.mxu0 %v3367_v11 }
  0x9a   :  { %2463 = vmatprep.subr.bf16.mxu0 %v3369_v12 }
  0x9d   :  { %2464 = vmatpush3.bf16.msra.mxu0 %v3369_v12 }
  0x9e   :  { %2465 = vmatprep.subr.bf16.mxu0 %v3380_v16 }
  0xa1   :  { %2466 = vmatpush3.bf16.msra.mxu0 %v3380_v16 }
  0xa2   :  { %2467 = vmatprep.subr.bf16.mxu0 %v3387_v18 }
  0xa5   :  { %2468 = vmatpush3.bf16.msra.mxu0 %v3387_v18 }
  0xa6   :  { %2469 = vmatprep.subr.bf16.mxu0 %v3397_v21 }
  0xa9   :  { %2470 = vmatpush3.bf16.msra.mxu0 %v3397_v21 }
  0xaa   :  { %2471 = vmatprep.subr.bf16.mxu0 %v3410_v24 }
  0xad   :  { %2472 = vmatpush3.bf16.msra.mxu0 %v3410_v24 }
  0xae   :  { %2473 = vmatprep.subr.bf16.mxu0 %v3420_v27 }
  0xb1   :  { %2474 = vmatpush3.bf16.msra.mxu0 %v3420_v27 }
  0xb2   :  { %934 = vmatprep.subr.bf16.mxu0 %v3336_v1 }
 0x137   :  { %v3495_v35 = vpop.f32.mrb[8].mxu0 }
 0x138   :  { %v3497_v36 = vpop.f32.mrb[9].mxu0 }
 0x139   :  { %v3499_v37 = vpop.f32.mrb[10].mxu0 }
 0x13a   :  { %v3501_v38 = vpop.f32.mrb[11].mxu0 }
 0x141   :  { %v3512_v46 = vpop.f32.mrb[0].mxu1 }
 0x142   :  { %v527_v47 = vpop.f32.mrb[1].mxu1 }
 0x143   :  { %v3515_v49 = vpop.f32.mrb[2].mxu1 }
 0x144   :  { %v3517_v50 = vpop.f32.mrb[3].mxu1 }
 0x157   :  { %v474_v54 = vpop.f32.mrb[0].mxu0 }
 0x158   :  { %v2612_v55 = vadd.f32 %v3519_v51, %v474_v54  ;;  %v476_v56 = vpop.f32.mrb[1].mxu0 }
 0x159   :  { %v478_v57 = vpop.f32.mrb[2].mxu0  ;;  %v2614_v6 = vadd.f32 %v3522_v59, %v476_v56 }
 0x15a   :  { %v546_v58 = vsub.f32 0.0, %v2612_v55  ;;  %v2616_v60 = vadd.f32 %v3519_v51, %v478_v57  ;;  %v480_v61 = vpop.f32.mrb[3].mxu0 }
 0x15b   :  { %v2618_v34 = vadd.f32 %v3522_v59, %v480_v61  ;;  %v570_v45 = vsub.f32 0.0, %v2614_v6 }
 0x15c   :  { %v550_v62 = vmul.f32 1.442695, %v546_v58  ;;  %v547_v63 = vsub.f32 0.0, %v2616_v60 }
 0x15d   :  { %v571_v54 = vsub.f32 0.0, %v2618_v34  ;;  %v574_v58 = vmul.f32 1.442695, %v570_v45  ;;  %v135_v34 = vsub.s32 2, %v3503_v40 }
 0x15e   :  { %2827 = vpow2.f32 %v550_v62  ;;  %v552_v9 = vmul.f32 1.442695, %v547_v63 }
 0x15f   :  { %v484_v33 = vpop.f32.mrb[4].mxu0  ;;  %v576_v63 = vmul.f32 1.442695, %v571_v54 }
 0x160   :  { %2829 = vpow2.f32 %v552_v9  ;;  %v2620_v39 = vadd.f32 %v3519_v51, %v484_v33  ;;  %v486_v41 = vpop.f32.mrb[5].mxu0 }
 0x161   :  { %v488_v44 = vpop.f32.mrb[6].mxu0  ;;  %v2622_v56 = vadd.f32 %v3522_v59, %v486_v41 }
 0x162   :  { %v548_v48 = vsub.f32 0.0, %v2620_v39  ;;  %v2624_v52 = vadd.f32 %v3519_v51, %v488_v44  ;;  %v490_v53 = vpop.f32.mrb[7].mxu0 }
 0x163   :  { %v2626_v61 = vadd.f32 %v3522_v59, %v490_v53  ;;  %v572_v6 = vsub.f32 0.0, %v2622_v56 }
 0x164   :  { %v554_v55 = vmul.f32 1.442695, %v548_v48  ;;  %v549_v57 = vsub.f32 0.0, %v2624_v52  ;;  %v3532_v48 = vrot.slane %v140_v42, %v135_v34 }
 0x165   :  { %v573_v44 = vsub.f32 0.0, %v2626_v61  ;;  %v578_v45 = vmul.f32 1.442695, %v572_v6 }
 0x166   :  { %2831 = vpow2.f32 %v554_v55  ;;  %v556_v60 = vmul.f32 1.442695, %v549_v57  ;;  %v3534_v57 = vrot.slane %v123_v43, %v135_v34  ;;  %v528_v53 = vadd.f32 %v527_v47, %v3532_v48 }
 0x167   :  { %v580_v52 = vmul.f32 1.442695, %v573_v44  ;;  %v536_v44 = vadd.f32 %v3512_v46, %v3532_v48 }
 0x168   :  { %v2828_v62 = vpop.eup %2827  ;;  %2833 = vpow2.f32 %v556_v60  ;;  %v298_v42 = vadd.f32 %v3497_v36, %v3534_v57 }
 0x169   :  { %v558_v9 = vadd.f32 1.0, %v2828_v62  ;;  %2835 = vpow2.f32 %v574_v58 }
 0x16a   :  { %v2830_v33 = vpop.eup %2829 }
 0x16b   :  { %2837 = vrcp.f32 %v558_v9  ;;  %v559_v39 = vadd.f32 1.0, %v2830_v33  ;;  %v301_v9 = vadd.f32 %v3501_v38, %v3534_v57  ;;  %v539_v38 = vadd.f32 %v3515_v49, %v3532_v48 }
 0x16c   :  { %2839 = vpow2.f32 %v576_v63  ;;  %v531_v63 = vadd.f32 %v3517_v50, %v3532_v48  ;;  %v306_v50 = vadd.f32 %v3495_v35, %v3534_v57 }
 0x16d   :  { %2841 = vrcp.f32 %v559_v39 }
 0x16e   :  { %2843 = vpow2.f32 %v578_v45 }
 0x170   :  { %v2832_v41 = vpop.eup %2831 }
 0x171   :  { %v560_v54 = vadd.f32 1.0, %v2832_v41 }
 0x172   :  { %v2834_v55 = vpop.eup %2833 }
 0x173   :  { %2845 = vrcp.f32 %v560_v54  ;;  %v561_v58 = vadd.f32 1.0, %v2834_v55  ;;  %v2836_v56 = vpop.eup %2835  ;;  %v309_v55 = vadd.f32 %v3499_v37, %v3534_v57 }
 0x174   :  { %2847 = vpow2.f32 %v580_v52  ;;  %v582_v43 = vadd.f32 1.0, %v2836_v56 }
 0x175   :  { %v2838_v40 = vpop.eup %2837  ;;  %2849 = vrcp.f32 %v561_v58 }
 0x176   :  { %v2840_v60 = vpop.eup %2839  ;;  %v590_v62 = vmul.f32 %v2838_v40, %v528_v53 }
 0x177   :  { %v2842_v61 = vpop.eup %2841  ;;  %v583_v6 = vadd.f32 1.0, %v2840_v60 }
 0x178   :  { %v594_v47 = vadd.f32 %v590_v62, %v298_v42  ;;  %v591_v33 = vmul.f32 %v2842_v61, %v531_v63  ;;  %v2844_v34 = vpop.eup %2843 }
 0x179   :  { %v584_v54 = vadd.f32 1.0, %v2844_v34 }
 0x17a   :  { %2851 = vtanh.f32 %v594_v47  ;;  %v595_v39 = vadd.f32 %v591_v33, %v301_v9 }
 0x17b   :  { %2853 = vrcp.f32 %v582_v43 }
 0x17c   :  { %2855 = vtanh.f32 %v595_v39 }
 0x17d   :  { %v2846_v36 = vpop.eup %2845  ;;  %2857 = vrcp.f32 %v583_v6 }
 0x17e   :  { %v2848_v45 = vpop.eup %2847  ;;  %v592_v41 = vmul.f32 %v2846_v36, %v536_v44 }
 0x17f   :  { %v2850_v52 = vpop.eup %2849  ;;  %v585_v56 = vadd.f32 1.0, %v2848_v45 }
 0x180   :  { %v596_v53 = vadd.f32 %v592_v41, %v306_v50  ;;  %v593_v58 = vmul.f32 %v2850_v52, %v539_v38  ;;  %v3573_v52 = vpop.f32.mrb[12].mxu0 }
 0x182   :  { %2859 = vtanh.f32 %v596_v53  ;;  %v597_v46 = vadd.f32 %v593_v58, %v309_v55  ;;  %v2811_v58 = vld [vmem:[#allocation2 + $0x20] sm:$0xff]  }
 0x183   :  { %2861 = vrcp.f32 %v584_v54  ;;  %v3575_v54 = vpop.f32.mrb[13].mxu0 }
 0x184   :  { %v2852_v40 = vpop.eup %2851  ;;  %2863 = vtanh.f32 %v597_v46  ;;  %v3577_v55 = vpop.f32.mrb[14].mxu0 }
 0x185   :  { %v2854_v60 = vpop.eup %2853  ;;  %v602_v35 = vsub.f32 0.0, %v2852_v40  ;;  %2865 = vrcp.f32 %v585_v56  ;;  %v3579_v53 = vpop.f32.mrb[15].mxu0 }
 0x186   :  { %v2856_v42 = vpop.eup %2855 }
 0x187   :  { %v603_v62 = vsub.f32 0.0, %v2856_v42  ;;  %v606_v63 = vmul.f32 %v2854_v60, %v602_v35  ;;  %v2858_v49 = vpop.eup %2857 }
 0x189   :  { %v607_v61 = vmul.f32 %v2858_v49, %v603_v62  ;;  %v3551_v43 = vadd.f32 %v2852_v40, %v606_v63 }
 0x18b   :  { %v3553_v9 = vadd.f32 %v2856_v42, %v607_v61 }
 0x18c   :  { %v2860_v37 = vpop.eup %2859 }
 0x18d   :  { %v2862_v47 = vpop.eup %2861  ;;  %v737_v33 = vpack.c.bf16 %v3553_v9, %v3551_v43  ;;  %v604_v6 = vsub.f32 0.0, %v2860_v37 }
 0x18e   :  { %v2864_v39 = vpop.eup %2863 }
 0x18f   :  { %772 = vmatmul.mubr.bf16.vlgmr.msra.gmra.mrb[4].mxu1 %v737_v33  ;;  %2475 = vmatprep.mubr.bf16.mxu0 %v737_v33  ;;  %v605_v34 = vsub.f32 0.0, %v2864_v39  ;;  %v608_v44 = vmul.f32 %v2862_v47, %v604_v6  ;;  %v2866_v36 = vpop.eup %2865 }
 0x190   :  { %781 = vmatprep.mubr.bf16.mxu1 %v4045_v0  ;;  %2480 = vmatpush3.bf16.msra.mxu1 %v3347_v5 }
 0x191   :  { %v609_v45 = vmul.f32 %v2866_v36, %v605_v34  ;;  %v3559_v50 = vadd.f32 %v2860_v37, %v608_v44  ;;  %2481 = vmatprep.subr.bf16.mxu1 %v3351_v7 }
 0x193   :  { %v3562_v41 = vadd.f32 %v2864_v39, %v609_v45 }
 0x194   :  { %2482 = vmatpush3.bf16.msra.mxu1 %v3351_v7 }
 0x195   :  { %v738_v38 = vpack.c.bf16 %v3562_v41, %v3559_v50  ;;  %2487 = vmatprep.subr.bf16.mxu1 %v3361_v10 }
 0x197   :  { %782 = vmatmul.mubr.bf16.gmra.mrb[8].mxu1 %v738_v38  ;;  %2476 = vmatmul.mubr.bf16.vlgmr.msra.gmra.mrb[16].mxu0 %v738_v38 }
 0x198   :  { %935 = vmatpush1.bf16.msra.mxu0 %v3338_v2  ;;  %966 = vmatprep.mubr.bf16.mxu0 %v4045_v0  ;;  %v2812_v2 = vld [vmem:[#allocation2 + $0x28] sm:$0xff]  }
 0x199   :  { %936 = vmatprep.subr.bf16.mxu0 %v3341_v3  ;;  %2483 = vmatprep.mubr.msk.bf16.mxu1 %vm203_vm0, %v2811_v58 }
 0x19c   :  { %937 = vmatpush1.bf16.msra.mxu0 %v3344_v4 }
 0x19d   :  { %1038 = vmatprep.subr.bf16.mxu0 %v3357_v8 }
 0x19f   :  { %2298 = vmatmul.mubr.msk.bf16.vlgmr.msra.gmra.mrb[20].mxu0 %vm203_vm0, %v2811_v58  ;;  %2484 = vmatmul.mubr.msk.bf16.vlgmr.msra.gmra.mrb[12].mxu1 %vm203_vm0, %v2812_v2 }
 0x1a0   :  { %1039 = vmatpush1.bf16.msra.mxu0 %v3372_v13  ;;  %976 = vmatprep.mubr.bf16.mxu0 %v4045_v0 }
 0x1a1   :  { %1040 = vmatprep.subr.bf16.mxu0 %v3375_v14  ;;  %2488 = vmatpush3.bf16.msra.mxu1 %v3361_v10 }
 0x1a2   :  { %2489 = vmatprep.subr.bf16.mxu1 %v3367_v11 }
 0x1a4   :  { %1041 = vmatpush1.bf16.msra.mxu0 %v3378_v15 }
 0x1a5   :  { %1042 = vmatprep.subr.bf16.mxu0 %v3383_v17  ;;  %2490 = vmatpush3.bf16.msra.mxu1 %v3367_v11 }
 0x1a6   :  { %2491 = vmatprep.subr.bf16.mxu1 %v3369_v12 }
 0x1a7   :  { %2299 = vmatmul.mubr.msk.bf16.gmra.mrb[24].mxu0 %vm203_vm0, %v2812_v2 }
 0x1a8   :  { %1043 = vmatpush1.bf16.msra.mxu0 %v3391_v19  ;;  %1070 = vmatprep.mubr.bf16.mxu0 %v4045_v0 }
 0x1a9   :  { %1044 = vmatprep.subr.bf16.mxu0 %v3394_v20  ;;  %2492 = vmatpush3.bf16.msra.mxu1 %v3369_v12 }
 0x1aa   :  { %2493 = vmatprep.subr.bf16.mxu1 %v3380_v16 }
 0x1ac   :  { %1045 = vmatpush1.bf16.msra.mxu0 %v3401_v22 }
 0x1ad   :  { %1046 = vmatprep.subr.bf16.mxu0 %v3404_v23  ;;  %2494 = vmatpush3.bf16.msra.mxu1 %v3380_v16 }
 0x1ae   :  { %2495 = vmatprep.subr.bf16.mxu1 %v3387_v18 }
 0x1b0   :  { %1047 = vmatpush1.bf16.msra.mxu0 %v3413_v25 }
 0x1b1   :  { %1048 = vmatprep.subr.bf16.mxu0 %v3416_v26  ;;  %2496 = vmatpush3.bf16.msra.mxu1 %v3387_v18 }
 0x1b2   :  { %2497 = vmatprep.subr.bf16.mxu1 %v3397_v21 }
 0x1b4   :  { %1049 = vmatpush1.bf16.msra.mxu0 %v3423_v28 }
 0x1b5   :  { %1050 = vmatprep.subr.bf16.mxu0 %v3426_v29  ;;  %2498 = vmatpush3.bf16.msra.mxu1 %v3397_v21 }
 0x1b6   :  { %2499 = vmatprep.subr.bf16.mxu1 %v3410_v24 }
 0x1b8   :  { %1051 = vmatpush1.bf16.msra.mxu0 %v3431_v30 }
 0x1b9   :  { %1052 = vmatprep.subr.bf16.mxu0 %v3434_v31  ;;  %2500 = vmatpush3.bf16.msra.mxu1 %v3410_v24 }
 0x1ba   :  { %2501 = vmatprep.subr.bf16.mxu1 %v3420_v27 }
 0x1bc   :  { %1053 = vmatpush1.bf16.msra.mxu0 %v3439_v32 }
 0x1bd   :  { %2507 = vmatprep.subr.bf16.mxu0 %v3347_v5  ;;  %2502 = vmatpush3.bf16.msra.mxu1 %v3420_v27 }
 0x1be   :  { %1233 = vmatprep.subr.bf16.mxu1 %v3336_v1 }
 0x262   :  { %v773_v3 = vpop.f32.mrb[4].mxu1 }
 0x263   :  { %v2628_v4 = vadd.f32 %v3519_v51, %v773_v3  ;;  %v775_v56 = vpop.f32.mrb[5].mxu1 }
 0x264   :  { %v777_v46 = vpop.f32.mrb[6].mxu1  ;;  %v2630_v63 = vadd.f32 %v3522_v59, %v775_v56 }
 0x265   :  { %v845_v40 = vsub.f32 0.0, %v2628_v4  ;;  %v2632_v60 = vadd.f32 %v3519_v51, %v777_v46  ;;  %v779_v35 = vpop.f32.mrb[7].mxu1 }
 0x266   :  { %v2634_v1 = vadd.f32 %v3522_v59, %v779_v35  ;;  %v869_v44 = vsub.f32 0.0, %v2630_v63 }
 0x267   :  { %v849_v42 = vmul.f32 1.442695, %v845_v40  ;;  %v846_v62 = vsub.f32 0.0, %v2632_v60 }
 0x268   :  { %v870_v2 = vsub.f32 0.0, %v2634_v1  ;;  %v873_v56 = vmul.f32 1.442695, %v869_v44 }
 0x269   :  { %2867 = vpow2.f32 %v849_v42  ;;  %v851_v49 = vmul.f32 1.442695, %v846_v62 }
 0x26a   :  { %v783_v61 = vpop.f32.mrb[8].mxu1  ;;  %v2477_v37 = vpop.f32.mrb[16].mxu0  ;;  %v875_v35 = vmul.f32 1.442695, %v870_v2 }
 0x26b   :  { %2869 = vpow2.f32 %v851_v49  ;;  %v2636_v47 = vadd.f32 %v3519_v51, %v783_v61  ;;  %v785_v33 = vpop.f32.mrb[9].mxu1  ;;  %v826_v6 = vpop.f32.mrb[17].mxu0 }
 0x26c   :  { %v787_v39 = vpop.f32.mrb[10].mxu1  ;;  %v2478_v34 = vpop.f32.mrb[18].mxu0  ;;  %v2638_v46 = vadd.f32 %v3522_v59, %v785_v33 }
 0x26d   :  { %v847_v36 = vsub.f32 0.0, %v2636_v47  ;;  %v2640_v45 = vadd.f32 %v3519_v51, %v787_v39  ;;  %v789_v38 = vpop.f32.mrb[11].mxu1  ;;  %v829_v58 = vpop.f32.mrb[19].mxu0 }
 0x26e   :  { %v2642_v42 = vadd.f32 %v3522_v59, %v789_v38  ;;  %v871_v49 = vsub.f32 0.0, %v2638_v46  ;;  %v827_v38 = vadd.f32 %v826_v6, %v3532_v48 }
 0x26f   :  { %v853_v3 = vmul.f32 1.442695, %v847_v36  ;;  %v848_v4 = vsub.f32 0.0, %v2640_v45 }
 0x270   :  { %v872_v1 = vsub.f32 0.0, %v2642_v42  ;;  %v877_v47 = vmul.f32 1.442695, %v871_v49  ;;  %v726_v42 = vadd.f32 %v3579_v53, %v3534_v57 }
 0x271   :  { %2871 = vpow2.f32 %v853_v3  ;;  %v855_v40 = vmul.f32 1.442695, %v848_v4 }
 0x272   :  { %v879_v44 = vmul.f32 1.442695, %v872_v1  ;;  %v835_v1 = vadd.f32 %v2477_v37, %v3532_v48 }
 0x273   :  { %v2868_v60 = vpop.eup %2867  ;;  %2873 = vpow2.f32 %v855_v40  ;;  %v830_v40 = vadd.f32 %v829_v58, %v3532_v48  ;;  %v731_v58 = vadd.f32 %v3573_v52, %v3534_v57 }
 0x274   :  { %v857_v62 = vadd.f32 1.0, %v2868_v60  ;;  %2875 = vpow2.f32 %v873_v56  ;;  %v723_v56 = vadd.f32 %v3575_v54, %v3534_v57 }
 0x275   :  { %v2870_v63 = vpop.eup %2869 }
 0x276   :  { %2877 = vrcp.f32 %v857_v62  ;;  %v858_v61 = vadd.f32 1.0, %v2870_v63 }
 0x277   :  { %2879 = vpow2.f32 %v875_v35 }
 0x278   :  { %2881 = vrcp.f32 %v858_v61 }
 0x279   :  { %2883 = vpow2.f32 %v877_v47 }
 0x27b   :  { %v2872_v39 = vpop.eup %2871 }
 0x27c   :  { %v859_v36 = vadd.f32 1.0, %v2872_v39 }
 0x27d   :  { %v2874_v33 = vpop.eup %2873 }
 0x27e   :  { %2885 = vrcp.f32 %v859_v36  ;;  %v860_v45 = vadd.f32 1.0, %v2874_v33  ;;  %v2876_v2 = vpop.eup %2875  ;;  %v734_v33 = vadd.f32 %v3577_v55, %v3534_v57 }
 0x27f   :  { %2887 = vpow2.f32 %v879_v44  ;;  %v881_v35 = vadd.f32 1.0, %v2876_v2  ;;  %v838_v44 = vadd.f32 %v2478_v34, %v3532_v48 }
 0x280   :  { %v2878_v3 = vpop.eup %2877  ;;  %2889 = vrcp.f32 %v860_v45 }
 0x281   :  { %v2880_v4 = vpop.eup %2879  ;;  %v889_v46 = vmul.f32 %v2878_v3, %v827_v38 }
 0x282   :  { %v2882_v60 = vpop.eup %2881  ;;  %v882_v49 = vadd.f32 1.0, %v2880_v4 }
 0x283   :  { %v893_v62 = vadd.f32 %v889_v46, %v723_v56  ;;  %v890_v63 = vmul.f32 %v2882_v60, %v830_v40  ;;  %v2884_v61 = vpop.eup %2883 }
 0x284   :  { %v883_v36 = vadd.f32 1.0, %v2884_v61 }
 0x285   :  { %2891 = vtanh.f32 %v893_v62  ;;  %v894_v6 = vadd.f32 %v890_v63, %v726_v42 }
 0x286   :  { %2893 = vrcp.f32 %v881_v35 }
 0x287   :  { %2895 = vtanh.f32 %v894_v6 }
 0x288   :  { %v2886_v47 = vpop.eup %2885  ;;  %2897 = vrcp.f32 %v882_v49 }
 0x289   :  { %v2888_v54 = vpop.eup %2887  ;;  %v891_v39 = vmul.f32 %v2886_v47, %v835_v1 }
 0x28a   :  { %v2890_v53 = vpop.eup %2889  ;;  %v884_v37 = vadd.f32 1.0, %v2888_v54 }
 0x28b   :  { %v895_v45 = vadd.f32 %v891_v39, %v731_v58  ;;  %v892_v2 = vmul.f32 %v2890_v53, %v838_v44  ;;  %v3667_v58 = vld [vmem:[#allocation5 + $0x18] ss:$12 sps:$4 sm:$0xff]  }
 0x28d   :  { %2899 = vtanh.f32 %v895_v45  ;;  %v896_v38 = vadd.f32 %v892_v2, %v734_v33 }
 0x28e   :  { %2901 = vrcp.f32 %v883_v36  ;;  %v2813_v36 = vld [vmem:[#allocation2 + $0x30] sm:$0xff]  }
 0x28f   :  { %v2892_v3 = vpop.eup %2891  ;;  %2903 = vtanh.f32 %v896_v38 }
 0x290   :  { %v2894_v4 = vpop.eup %2893  ;;  %v901_v52 = vsub.f32 %v3551_v43, %v2892_v3  ;;  %2905 = vrcp.f32 %v884_v37 }
 0x291   :  { %v2896_v56 = vpop.eup %2895 }
 0x292   :  { %v902_v34 = vsub.f32 %v3553_v9, %v2896_v56  ;;  %v905_v46 = vmul.f32 %v2894_v4, %v901_v52  ;;  %v2898_v40 = vpop.eup %2897 }
 0x294   :  { %v906_v60 = vmul.f32 %v2898_v40, %v902_v34  ;;  %v3641_v35 = vadd.f32 %v2892_v3, %v905_v46 }
 0x296   :  { %v3643_v55 = vadd.f32 %v2896_v56, %v906_v60 }
 0x297   :  { %v2900_v42 = vpop.eup %2899 }
 0x298   :  { %v2902_v62 = vpop.eup %2901  ;;  %v1036_v63 = vpack.c.bf16 %v3643_v55, %v3641_v35  ;;  %v903_v49 = vsub.f32 %v3559_v50, %v2900_v42 }
 0x299   :  { %v2904_v6 = vpop.eup %2903 }
 0x29a   :  { %1071 = vmatmul.mubr.bf16.vlgmr.msra.gmra.mrb[20].mxu0 %v1036_v63  ;;  %2503 = vmatprep.mubr.bf16.mxu1 %v1036_v63  ;;  %v904_v43 = vsub.f32 %v3562_v41, %v2904_v6  ;;  %v907_v9 = vmul.f32 %v2902_v62, %v903_v49  ;;  %v2906_v61 = vpop.eup %2905  ;;  %v3660_v41 = vld [vmem:[#allocation5] ss:$12 sps:$4 sm:$0xff]  }
 0x29b   :  { %1080 = vmatprep.mubr.bf16.mxu0 %v4045_v0  ;;  %2508 = vmatpush3.bf16.msra.mxu0 %v3347_v5  ;;  %v3664_v5 = vld [vmem:[#allocation5 + $0x1c] ss:$12 sps:$4 sm:$0xff]  }
 0x29c   :  { %v908_v1 = vmul.f32 %v2906_v61, %v904_v43  ;;  %v3651_v47 = vadd.f32 %v2900_v42, %v907_v9  ;;  %2509 = vmatprep.subr.bf16.mxu0 %v3351_v7 }
 0x29e   :  { %v3654_v54 = vadd.f32 %v2904_v6, %v908_v1 }
 0x29f   :  { %2510 = vmatpush3.bf16.msra.mxu0 %v3351_v7  ;;  %v3671_v7 = vpop.f32.mrb[12].mxu1 }
 0x2a0   :  { %v1037_v50 = vpack.c.bf16 %v3654_v54, %v3651_v47  ;;  %2515 = vmatprep.subr.bf16.mxu0 %v3361_v10  ;;  %v3673_v39 = vpop.f32.mrb[13].mxu1 }
 0x2a1   :  { %v3675_v44 = vpop.f32.mrb[14].mxu1 }
 0x2a2   :  { %1081 = vmatmul.mubr.bf16.gmra.mrb[24].mxu0 %v1037_v50  ;;  %2504 = vmatmul.mubr.bf16.vlgmr.msra.gmra.mrb[16].mxu1 %v1037_v50  ;;  %v3677_v53 = vpop.f32.mrb[15].mxu1 }
 0x2a3   :  { %1234 = vmatpush1.bf16.msra.mxu1 %v3660_v41  ;;  %1265 = vmatprep.mubr.bf16.mxu1 %v4045_v0 }
 0x2a4   :  { %1235 = vmatprep.subr.bf16.mxu1 %v3664_v5  ;;  %2511 = vmatprep.mubr.msk.bf16.mxu0 %vm203_vm0, %v2813_v36 }
 0x2a7   :  { %1236 = vmatpush1.bf16.msra.mxu1 %v3667_v58 }
 0x2a8   :  { %1337 = vmatprep.subr.bf16.mxu1 %v3357_v8  ;;  %v2814_v8 = vld [vmem:[#allocation2 + $0x38] sm:$0xff]  }
 0x2aa   :  { %2304 = vmatmul.mubr.msk.bf16.vlgmr.msra.gmra.mrb[20].mxu1 %vm203_vm0, %v2813_v36  ;;  %2512 = vmatmul.mubr.msk.bf16.vlgmr.msra.gmra.mrb[28].mxu0 %vm203_vm0, %v2814_v8 }
 0x2ab   :  { %1338 = vmatpush1.bf16.msra.mxu1 %v3372_v13  ;;  %1275 = vmatprep.mubr.bf16.mxu1 %v4045_v0 }
 0x2ac   :  { %1339 = vmatprep.subr.bf16.mxu1 %v3375_v14  ;;  %2516 = vmatpush3.bf16.msra.mxu0 %v3361_v10  ;;  %v3712_v10 = vld [vmem:[#allocation5 + $0x8] ss:$12 sps:$4 sm:$0xff]  }
 0x2ad   :  { %2517 = vmatprep.subr.bf16.mxu0 %v3367_v11 }
 0x2af   :  { %1340 = vmatpush1.bf16.msra.mxu1 %v3378_v15 }
 0x2b0   :  { %1341 = vmatprep.subr.bf16.mxu1 %v3383_v17  ;;  %2518 = vmatpush3.bf16.msra.mxu0 %v3367_v11  ;;  %v3718_v11 = vld [vmem:[#allocation5 + $0x4] ss:$12 sps:$4 sm:$0xff]  }
 0x2b1   :  { %2519 = vmatprep.subr.bf16.mxu0 %v3369_v12 }
 0x2b2   :  { %2305 = vmatmul.mubr.msk.bf16.gmra.mrb[24].mxu1 %vm203_vm0, %v2814_v8 }
 0x2b3   :  { %1342 = vmatpush1.bf16.msra.mxu1 %v3391_v19  ;;  %1369 = vmatprep.mubr.bf16.mxu1 %v4045_v0 }
 0x2b4   :  { %1343 = vmatprep.subr.bf16.mxu1 %v3394_v20  ;;  %2520 = vmatpush3.bf16.msra.mxu0 %v3369_v12 }
 0x2b5   :  { %2521 = vmatprep.subr.bf16.mxu0 %v3380_v16 }
 0x2b7   :  { %1344 = vmatpush1.bf16.msra.mxu1 %v3401_v22 }
 0x2b8   :  { %1345 = vmatprep.subr.bf16.mxu1 %v3404_v23  ;;  %2522 = vmatpush3.bf16.msra.mxu0 %v3380_v16 }
 0x2b9   :  { %2523 = vmatprep.subr.bf16.mxu0 %v3387_v18 }
 0x2bb   :  { %1346 = vmatpush1.bf16.msra.mxu1 %v3413_v25 }
 0x2bc   :  { %1347 = vmatprep.subr.bf16.mxu1 %v3416_v26  ;;  %2524 = vmatpush3.bf16.msra.mxu0 %v3387_v18 }
 0x2bd   :  { %2525 = vmatprep.subr.bf16.mxu0 %v3397_v21 }
 0x2bf   :  { %1348 = vmatpush1.bf16.msra.mxu1 %v3423_v28 }
 0x2c0   :  { %1349 = vmatprep.subr.bf16.mxu1 %v3426_v29  ;;  %2526 = vmatpush3.bf16.msra.mxu0 %v3397_v21 }
 0x2c1   :  { %2527 = vmatprep.subr.bf16.mxu0 %v3410_v24 }
 0x2c3   :  { %1350 = vmatpush1.bf16.msra.mxu1 %v3431_v30 }
 0x2c4   :  { %1351 = vmatprep.subr.bf16.mxu1 %v3434_v31  ;;  %2528 = vmatpush3.bf16.msra.mxu0 %v3410_v24 }
 0x2c5   :  { %2529 = vmatprep.subr.bf16.mxu0 %v3420_v27 }
 0x2c7   :  { %1352 = vmatpush1.bf16.msra.mxu1 %v3439_v32 }
 0x2c8   :  { %2535 = vmatprep.subr.bf16.mxu1 %v3712_v10  ;;  %2530 = vmatpush3.bf16.msra.mxu0 %v3420_v27 }
 0x2c9   :  { %1532 = vmatprep.subr.bf16.mxu0 %v3718_v11 }
 0x36d   :  { %v1072_v12 = vpop.f32.mrb[20].mxu0 }
 0x36e   :  { %v2644_v13 = vadd.f32 %v3519_v51, %v1072_v12  ;;  %v1074_v14 = vpop.f32.mrb[21].mxu0 }
 0x36f   :  { %v1076_v15 = vpop.f32.mrb[22].mxu0  ;;  %v2646_v21 = vadd.f32 %v3522_v59, %v1074_v14  ;;  %v1022_v14 = vadd.f32 %v3673_v39, %v3534_v57 }
 0x370   :  { %v1144_v16 = vsub.f32 0.0, %v2644_v13  ;;  %v2648_v17 = vadd.f32 %v3519_v51, %v1076_v15  ;;  %v1078_v18 = vpop.f32.mrb[23].mxu0 }
 0x371   :  { %v2650_v25 = vadd.f32 %v3522_v59, %v1078_v18  ;;  %v1168_v31 = vsub.f32 0.0, %v2646_v21 }
 0x372   :  { %v1148_v19 = vmul.f32 1.442695, %v1144_v16  ;;  %v1145_v20 = vsub.f32 0.0, %v2648_v17 }
 0x373   :  { %v1169_v38 = vsub.f32 0.0, %v2650_v25  ;;  %v1172_v4 = vmul.f32 1.442695, %v1168_v31 }
 0x374   :  { %2907 = vpow2.f32 %v1148_v19  ;;  %v1150_v22 = vmul.f32 1.442695, %v1145_v20  ;;  %v1025_v19 = vadd.f32 %v3677_v53, %v3534_v57 }
 0x375   :  { %v1082_v23 = vpop.f32.mrb[24].mxu0  ;;  %v2505_v24 = vpop.f32.mrb[16].mxu1  ;;  %v1174_v46 = vmul.f32 1.442695, %v1169_v38 }
 0x376   :  { %2909 = vpow2.f32 %v1150_v22  ;;  %v2652_v26 = vadd.f32 %v3519_v51, %v1082_v23  ;;  %v1084_v27 = vpop.f32.mrb[25].mxu0  ;;  %v1125_v28 = vpop.f32.mrb[17].mxu1 }
 0x377   :  { %v1086_v29 = vpop.f32.mrb[26].mxu0  ;;  %v2506_v30 = vpop.f32.mrb[18].mxu1  ;;  %v2654_v52 = vadd.f32 %v3522_v59, %v1084_v27  ;;  %v1126_v8 = vadd.f32 %v1125_v28, %v3532_v48  ;;  %v1030_v28 = vadd.f32 %v3671_v7, %v3534_v57 }
 0x378   :  { %v1146_v32 = vsub.f32 0.0, %v2652_v26  ;;  %v2656_v33 = vadd.f32 %v3519_v51, %v1086_v29  ;;  %v1088_v45 = vpop.f32.mrb[27].mxu0  ;;  %v1128_v2 = vpop.f32.mrb[19].mxu1  ;;  %v1134_v26 = vadd.f32 %v2505_v24, %v3532_v48  ;;  %v1137_v31 = vadd.f32 %v2506_v30, %v3532_v48 }
 0x379   :  { %v2658_v40 = vadd.f32 %v3522_v59, %v1088_v45  ;;  %v1170_v62 = vsub.f32 0.0, %v2654_v52  ;;  %v1129_v16 = vadd.f32 %v1128_v2, %v3532_v48 }
 0x37a   :  { %v1152_v37 = vmul.f32 1.442695, %v1146_v32  ;;  %v1147_v3 = vsub.f32 0.0, %v2656_v33  ;;  %v1033_v33 = vadd.f32 %v3675_v44, %v3534_v57 }
 0x37b   :  { %v1171_v49 = vsub.f32 0.0, %v2658_v40  ;;  %v1176_v6 = vmul.f32 1.442695, %v1170_v62 }
 0x37c   :  { %2911 = vpow2.f32 %v1152_v37  ;;  %v1154_v56 = vmul.f32 1.442695, %v1147_v3 }
 0x37d   :  { %v1178_v9 = vmul.f32 1.442695, %v1171_v49 }
 0x37e   :  { %v2908_v34 = vpop.eup %2907  ;;  %2913 = vpow2.f32 %v1154_v56 }
 0x37f   :  { %v1156_v60 = vadd.f32 1.0, %v2908_v34  ;;  %2915 = vpow2.f32 %v1172_v4 }
 0x380   :  { %v2910_v42 = vpop.eup %2909 }
 0x381   :  { %2917 = vrcp.f32 %v1156_v60  ;;  %v1157_v63 = vadd.f32 1.0, %v2910_v42 }
 0x382   :  { %2919 = vpow2.f32 %v1174_v46 }
 0x383   :  { %2921 = vrcp.f32 %v1157_v63 }
 0x384   :  { %2923 = vpow2.f32 %v1176_v6 }
 0x386   :  { %v2912_v43 = vpop.eup %2911 }
 0x387   :  { %v1158_v61 = vadd.f32 1.0, %v2912_v43 }
 0x388   :  { %v2914_v1 = vpop.eup %2913 }
 0x389   :  { %2925 = vrcp.f32 %v1158_v61  ;;  %v1159_v50 = vadd.f32 1.0, %v2914_v1  ;;  %v2916_v36 = vpop.eup %2915  ;;  %v3770_v1 = vld [vmem:[#allocation7 + $0x4] ss:$12 sps:$4 sm:$0xff]  }
 0x38a   :  { %2927 = vpow2.f32 %v1178_v9  ;;  %v1180_v18 = vadd.f32 1.0, %v2916_v36  ;;  %v3755_v9 = vld [vmem:[#allocation5 + $0x20] ss:$12 sps:$4 sm:$0xff]  }
 0x38b   :  { %v2918_v12 = vpop.eup %2917  ;;  %2929 = vrcp.f32 %v1159_v50  ;;  %v3773_v50 = vpop.f32.mrb[28].mxu0 }
 0x38c   :  { %v2920_v13 = vpop.eup %2919  ;;  %v1188_v15 = vmul.f32 %v2918_v12, %v1126_v8  ;;  %v3775_v36 = vpop.f32.mrb[29].mxu0 }
 0x38d   :  { %v2922_v17 = vpop.eup %2921  ;;  %v1181_v22 = vadd.f32 1.0, %v2920_v13  ;;  %v3777_v8 = vpop.f32.mrb[30].mxu0  ;;  %v2815_v13 = vld [vmem:[#allocation2 + $0x40] sm:$0xff]  }
 0x38e   :  { %v1192_v20 = vadd.f32 %v1188_v15, %v1022_v14  ;;  %v1189_v21 = vmul.f32 %v2922_v17, %v1129_v16  ;;  %v2924_v25 = vpop.eup %2923  ;;  %v3779_v12 = vpop.f32.mrb[31].mxu0  ;;  %v3783_v14 = vld [vmem:[#allocation7] ss:$12 sps:$4 sm:$0xff]   ;;  %v3787_v15 = vld [vmem:[#allocation7 + $0x1c] ss:$12 sps:$4 sm:$0xff]  }
 0x38f   :  { %v1182_v32 = vadd.f32 1.0, %v2924_v25  ;;  %v3790_v16 = vld [vmem:[#allocation7 + $0x18] ss:$12 sps:$4 sm:$0xff]   ;;  %v3793_v17 = vld [vmem:[#allocation7 + $0x34] ss:$12 sps:$4 sm:$0xff]  }
 0x390   :  { %2931 = vtanh.f32 %v1192_v20  ;;  %v1193_v23 = vadd.f32 %v1189_v21, %v1025_v19  ;;  %v3798_v19 = vld [vmem:[#allocation7 + $0x30] ss:$12 sps:$4 sm:$0xff]   ;;  %v3802_v20 = vld [vmem:[#allocation7 + $0x4c] ss:$12 sps:$4 sm:$0xff]  }
 0x391   :  { %2933 = vrcp.f32 %v1180_v18  ;;  %v2816_v18 = vld [vmem:[#allocation2 + $0x48] sm:$0xff]   ;;  %v3805_v21 = vld [vmem:[#allocation7 + $0x20] ss:$12 sps:$4 sm:$0xff]  }
 0x392   :  { %2935 = vtanh.f32 %v1193_v23  ;;  %v3813_v23 = vld [vmem:[#allocation7 + $0x64] ss:$12 sps:$4 sm:$0xff]  }
 0x393   :  { %v2926_v27 = vpop.eup %2925  ;;  %2937 = vrcp.f32 %v1181_v22  ;;  %v3809_v22 = vld [vmem:[#allocation7 + $0x48] ss:$12 sps:$4 sm:$0xff]   ;;  %v3816_v25 = vld [vmem:[#allocation7 + $0x38] ss:$12 sps:$4 sm:$0xff]  }
 0x394   :  { %v2928_v39 = vpop.eup %2927  ;;  %v1190_v29 = vmul.f32 %v2926_v27, %v1134_v26  ;;  %v3819_v26 = vld [vmem:[#allocation7 + $0x60] ss:$12 sps:$4 sm:$0xff]   ;;  %v3823_v27 = vld [vmem:[#allocation7 + $0x7c] ss:$12 sps:$4 sm:$0xff]  }
 0x395   :  { %v2930_v53 = vpop.eup %2929  ;;  %v1183_v24 = vadd.f32 1.0, %v2928_v39  ;;  %v3826_v39 = vld [vmem:[#allocation7 + $0x50] ss:$12 sps:$4 sm:$0xff]  }
 0x396   :  { %v1194_v45 = vadd.f32 %v1190_v29, %v1030_v28  ;;  %v1191_v2 = vmul.f32 %v2930_v53, %v1137_v31  ;;  %v3829_v28 = vld [vmem:[#allocation7 + $0x78] ss:$12 sps:$4 sm:$0xff]   ;;  %v3833_v29 = vld [vmem:[#allocation7 + $0x94] ss:$12 sps:$4 sm:$0xff]   ;;  %v3839_v53 = vld [vmem:[#allocation7 + $0x90] ss:$12 sps:$4 sm:$0xff]  }
 0x397   :  { %v3836_v31 = vld [vmem:[#allocation7 + $0x68] ss:$12 sps:$4 sm:$0xff]  }
 0x398   :  { %2939 = vtanh.f32 %v1194_v45  ;;  %v1195_v38 = vadd.f32 %v1191_v2, %v1033_v33  ;;  %v3846_v33 = vld [vmem:[#allocation7 + $0x80] ss:$12 sps:$4 sm:$0xff]   ;;  %v3849_v45 = vld [vmem:[#allocation7 + $0xa8] ss:$12 sps:$4 sm:$0xff]   ;;  %v3853_v2 = vld [vmem:[#allocation7 + $0x98] ss:$12 sps:$4 sm:$0xff]  }
 0x399   :  { %2941 = vrcp.f32 %v1182_v32  ;;  %v3843_v32 = vld [vmem:[#allocation7 + $0xac] ss:$12 sps:$4 sm:$0xff]  }
 0x39a   :  { %v2932_v37 = vpop.eup %2931  ;;  %2943 = vtanh.f32 %v1195_v38  ;;  %v3858_v38 = vld [vmem:[#allocation7 + $0xb0] ss:$12 sps:$4 sm:$0xff]  }
 0x39b   :  { %v2934_v3 = vpop.eup %2933  ;;  %v1200_v7 = vsub.f32 %v3641_v35, %v2932_v37  ;;  %2945 = vrcp.f32 %v1183_v24 }
 0x39c   :  { %v2936_v4 = vpop.eup %2935 }
 0x39d   :  { %v1201_v30 = vsub.f32 %v3643_v55, %v2936_v4  ;;  %v1204_v52 = vmul.f32 %v2934_v3, %v1200_v7  ;;  %v2938_v56 = vpop.eup %2937 }
 0x39f   :  { %v1205_v34 = vmul.f32 %v2938_v56, %v1201_v30  ;;  %v3743_v46 = vadd.f32 %v2932_v37, %v1204_v52 }
 0x3a1   :  { %v3745_v44 = vadd.f32 %v2936_v4, %v1205_v34 }
 0x3a2   :  { %v2940_v40 = vpop.eup %2939 }
 0x3a3   :  { %v2942_v60 = vpop.eup %2941  ;;  %v1335_v42 = vpack.c.bf16 %v3745_v44, %v3743_v46  ;;  %v1202_v62 = vsub.f32 %v3651_v47, %v2940_v40 }
 0x3a4   :  { %v2944_v63 = vpop.eup %2943 }
 0x3a5   :  { %1370 = vmatmul.mubr.bf16.vlgmr.msra.gmra.mrb[20].mxu1 %v1335_v42  ;;  %2531 = vmatprep.mubr.bf16.mxu0 %v1335_v42  ;;  %v1203_v35 = vsub.f32 %v3654_v54, %v2944_v63  ;;  %v1206_v55 = vmul.f32 %v2942_v60, %v1202_v62  ;;  %v2946_v49 = vpop.eup %2945  ;;  %v3763_v54 = vld [vmem:[#allocation7 + $0x8] ss:$12 sps:$4 sm:$0xff]  }
 0x3a6   :  { %1379 = vmatprep.mubr.bf16.mxu1 %v4045_v0  ;;  %2536 = vmatpush3.bf16.msra.mxu1 %v3712_v10 }
 0x3a7   :  { %v1207_v6 = vmul.f32 %v2946_v49, %v1203_v35  ;;  %v3753_v43 = vadd.f32 %v2940_v40, %v1206_v55  ;;  %2537 = vmatprep.subr.bf16.mxu1 %v3755_v9 }
 0x3a9   :  { %v3758_v61 = vadd.f32 %v2944_v63, %v1207_v6 }
 0x3aa   :  { %2538 = vmatpush3.bf16.msra.mxu1 %v3755_v9 }
 0x3ab   :  { %v1336_v47 = vpack.c.bf16 %v3758_v61, %v3753_v43  ;;  %2543 = vmatprep.subr.bf16.mxu1 %v3763_v54 }
 0x3ad   :  { %1380 = vmatmul.mubr.bf16.gmra.mrb[24].mxu1 %v1336_v47  ;;  %2532 = vmatmul.mubr.bf16.vlgmr.msra.gmra.mrb[32].mxu0 %v1336_v47 }
 0x3ae   :  { %1533 = vmatpush1.bf16.msra.mxu0 %v3660_v41  ;;  %1564 = vmatprep.mubr.bf16.mxu0 %v4045_v0 }
 0x3af   :  { %1534 = vmatprep.subr.bf16.mxu0 %v3664_v5  ;;  %2539 = vmatprep.mubr.msk.bf16.mxu1 %vm203_vm0, %v2815_v13 }
 0x3b2   :  { %1535 = vmatpush1.bf16.msra.mxu0 %v3667_v58 }
 0x3b3   :  { %1636 = vmatprep.subr.bf16.mxu0 %v3770_v1 }
 0x3b5   :  { %2310 = vmatmul.mubr.msk.bf16.vlgmr.msra.gmra.mrb[36].mxu0 %vm203_vm0, %v2815_v13  ;;  %2540 = vmatmul.mubr.msk.bf16.vlgmr.msra.gmra.mrb[28].mxu1 %vm203_vm0, %v2816_v18 }
 0x3b6   :  { %1637 = vmatpush1.bf16.msra.mxu0 %v3783_v14  ;;  %1574 = vmatprep.mubr.bf16.mxu0 %v4045_v0 }
 0x3b7   :  { %1638 = vmatprep.subr.bf16.mxu0 %v3787_v15  ;;  %2544 = vmatpush3.bf16.msra.mxu1 %v3763_v54 }
 0x3b8   :  { %2545 = vmatprep.subr.bf16.mxu1 %v3805_v21 }
 0x3ba   :  { %1639 = vmatpush1.bf16.msra.mxu0 %v3790_v16 }
 0x3bb   :  { %1640 = vmatprep.subr.bf16.mxu0 %v3793_v17  ;;  %2546 = vmatpush3.bf16.msra.mxu1 %v3805_v21 }
 0x3bc   :  { %2547 = vmatprep.subr.bf16.mxu1 %v3816_v25 }
 0x3bd   :  { %2311 = vmatmul.mubr.msk.bf16.gmra.mrb[40].mxu0 %vm203_vm0, %v2816_v18 }
 0x3be   :  { %1641 = vmatpush1.bf16.msra.mxu0 %v3798_v19  ;;  %1668 = vmatprep.mubr.bf16.mxu0 %v4045_v0 }
 0x3bf   :  { %1642 = vmatprep.subr.bf16.mxu0 %v3802_v20  ;;  %2548 = vmatpush3.bf16.msra.mxu1 %v3816_v25 }
 0x3c0   :  { %2549 = vmatprep.subr.bf16.mxu1 %v3826_v39 }
 0x3c2   :  { %1643 = vmatpush1.bf16.msra.mxu0 %v3809_v22 }
 0x3c3   :  { %1644 = vmatprep.subr.bf16.mxu0 %v3813_v23  ;;  %2550 = vmatpush3.bf16.msra.mxu1 %v3826_v39 }
 0x3c4   :  { %2551 = vmatprep.subr.bf16.mxu1 %v3836_v31 }
 0x3c6   :  { %1645 = vmatpush1.bf16.msra.mxu0 %v3819_v26 }
 0x3c7   :  { %1646 = vmatprep.subr.bf16.mxu0 %v3823_v27  ;;  %2552 = vmatpush3.bf16.msra.mxu1 %v3836_v31 }
 0x3c8   :  { %2553 = vmatprep.subr.bf16.mxu1 %v3846_v33 }
 0x3ca   :  { %1647 = vmatpush1.bf16.msra.mxu0 %v3829_v28 }
 0x3cb   :  { %1648 = vmatprep.subr.bf16.mxu0 %v3833_v29  ;;  %2554 = vmatpush3.bf16.msra.mxu1 %v3846_v33 }
 0x3cc   :  { %2555 = vmatprep.subr.bf16.mxu1 %v3853_v2 }
 0x3ce   :  { %1649 = vmatpush1.bf16.msra.mxu0 %v3839_v53 }
 0x3cf   :  { %1650 = vmatprep.subr.bf16.mxu0 %v3843_v32  ;;  %2556 = vmatpush3.bf16.msra.mxu1 %v3853_v2 }
 0x3d0   :  { %2557 = vmatprep.subr.bf16.mxu1 %v3858_v38 }
 0x3d2   :  { %1651 = vmatpush1.bf16.msra.mxu0 %v3849_v45 }
 0x3d3   :  { %2563 = vmatprep.subr.bf16.mxu0 %v3712_v10  ;;  %2558 = vmatpush3.bf16.msra.mxu1 %v3858_v38 }
 0x3d4   :  { %1831 = vmatprep.subr.bf16.mxu1 %v3718_v11 }
 0x478   :  { %v1371_v24 = vpop.f32.mrb[20].mxu1 }
 0x479   :  { %v2660_v37 = vadd.f32 %v3519_v51, %v1371_v24  ;;  %v1373_v3 = vpop.f32.mrb[21].mxu1 }
 0x47a   :  { %v1375_v7 = vpop.f32.mrb[22].mxu1  ;;  %v2662_v40 = vadd.f32 %v3522_v59, %v1373_v3 }
 0x47b   :  { %v1443_v4 = vsub.f32 0.0, %v2660_v37  ;;  %v2664_v30 = vadd.f32 %v3519_v51, %v1375_v7  ;;  %v1377_v52 = vpop.f32.mrb[23].mxu1 }
 0x47c   :  { %v2666_v11 = vadd.f32 %v3522_v59, %v1377_v52  ;;  %v1467_v47 = vsub.f32 0.0, %v2662_v40 }
 0x47d   :  { %v1447_v56 = vmul.f32 1.442695, %v1443_v4  ;;  %v1444_v34 = vsub.f32 0.0, %v2664_v30 }
 0x47e   :  { %v1468_v7 = vsub.f32 0.0, %v2666_v11  ;;  %v1471_v30 = vmul.f32 1.442695, %v1467_v47 }
 0x47f   :  { %2947 = vpow2.f32 %v1447_v56  ;;  %v1449_v60 = vmul.f32 1.442695, %v1444_v34 }
 0x480   :  { %v1381_v42 = vpop.f32.mrb[24].mxu1  ;;  %v2533_v62 = vpop.f32.mrb[32].mxu0 }
 0x481   :  { %2949 = vpow2.f32 %v1449_v60  ;;  %v2668_v63 = vadd.f32 %v3519_v51, %v1381_v42  ;;  %v1383_v35 = vpop.f32.mrb[25].mxu1  ;;  %v1424_v55 = vpop.f32.mrb[33].mxu0  ;;  %v1473_v60 = vmul.f32 1.442695, %v1468_v7 }
 0x482   :  { %v1385_v49 = vpop.f32.mrb[26].mxu1  ;;  %v2534_v6 = vpop.f32.mrb[34].mxu0  ;;  %v2670_v56 = vadd.f32 %v3522_v59, %v1383_v35 }
 0x483   :  { %v1445_v13 = vsub.f32 0.0, %v2668_v63  ;;  %v2672_v18 = vadd.f32 %v3519_v51, %v1385_v49  ;;  %v1387_v24 = vpop.f32.mrb[27].mxu1  ;;  %v1427_v37 = vpop.f32.mrb[35].mxu0 }
 0x484   :  { %v2674_v42 = vadd.f32 %v3522_v59, %v1387_v24  ;;  %v1469_v63 = vsub.f32 0.0, %v2670_v56  ;;  %v1425_v24 = vadd.f32 %v1424_v55, %v3532_v48 }
 0x485   :  { %v1451_v3 = vmul.f32 1.442695, %v1445_v13  ;;  %v1446_v4 = vsub.f32 0.0, %v2672_v18 }
 0x486   :  { %v1470_v11 = vsub.f32 0.0, %v2674_v42  ;;  %v1475_v13 = vmul.f32 1.442695, %v1469_v63 }
 0x487   :  { %2951 = vpow2.f32 %v1451_v3  ;;  %v1453_v52 = vmul.f32 1.442695, %v1446_v4 }
 0x488   :  { %v1477_v18 = vmul.f32 1.442695, %v1470_v11 }
 0x489   :  { %v2948_v34 = vpop.eup %2947  ;;  %2953 = vpow2.f32 %v1453_v52 }
 0x48a   :  { %v1455_v0 = vadd.f32 1.0, %v2948_v34  ;;  %2955 = vpow2.f32 %v1471_v30  ;;  %v1428_v34 = vadd.f32 %v1427_v37, %v3532_v48  ;;  %v1329_v37 = vadd.f32 %v3773_v50, %v3534_v57 }
 0x48b   :  { %v2950_v40 = vpop.eup %2949 }
 0x48c   :  { %2957 = vrcp.f32 %v1455_v0  ;;  %v1456_v49 = vadd.f32 1.0, %v2950_v40  ;;  %v1321_v0 = vadd.f32 %v3775_v36, %v3534_v57  ;;  %v1324_v40 = vadd.f32 %v3779_v12, %v3534_v57 }
 0x48d   :  { %2959 = vpow2.f32 %v1473_v60 }
 0x48e   :  { %2961 = vrcp.f32 %v1456_v49 }
 0x48f   :  { %2963 = vpow2.f32 %v1475_v13 }
 0x491   :  { %v2952_v47 = vpop.eup %2951 }
 0x492   :  { %v1457_v3 = vadd.f32 1.0, %v2952_v47  ;;  %v1433_v47 = vadd.f32 %v2533_v62, %v3532_v48 }
 0x493   :  { %v2954_v35 = vpop.eup %2953 }
 0x494   :  { %2965 = vrcp.f32 %v1457_v3  ;;  %v1458_v7 = vadd.f32 1.0, %v2954_v35  ;;  %v2956_v4 = vpop.eup %2955  ;;  %v1436_v35 = vadd.f32 %v2534_v6, %v3532_v48 }
 0x495   :  { %2967 = vpow2.f32 %v1477_v18  ;;  %v1479_v42 = vadd.f32 1.0, %v2956_v4  ;;  %v1332_v4 = vadd.f32 %v3777_v8, %v3534_v57 }
 0x496   :  { %v2958_v52 = vpop.eup %2957  ;;  %2969 = vrcp.f32 %v1458_v7 }
 0x497   :  { %v2960_v30 = vpop.eup %2959  ;;  %v1487_v56 = vmul.f32 %v2958_v52, %v1425_v24 }
 0x498   :  { %v2962_v60 = vpop.eup %2961  ;;  %v1480_v11 = vadd.f32 1.0, %v2960_v30 }
 0x499   :  { %v1491_v63 = vadd.f32 %v1487_v56, %v1321_v0  ;;  %v1488_v49 = vmul.f32 %v2962_v60, %v1428_v34  ;;  %v2964_v13 = vpop.eup %2963 }
 0x49a   :  { %v1481_v7 = vadd.f32 1.0, %v2964_v13 }
 0x49b   :  { %2971 = vtanh.f32 %v1491_v63  ;;  %v1492_v55 = vadd.f32 %v1488_v49, %v1324_v40 }
 0x49c   :  { %2973 = vrcp.f32 %v1479_v42 }
 0x49d   :  { %2975 = vtanh.f32 %v1492_v55 }
 0x49e   :  { %v2966_v18 = vpop.eup %2965  ;;  %2977 = vrcp.f32 %v1480_v11 }
 0x49f   :  { %v2968_v36 = vpop.eup %2967  ;;  %v1489_v3 = vmul.f32 %v2966_v18, %v1433_v47 }
 0x4a0   :  { %v2970_v12 = vpop.eup %2969  ;;  %v1482_v62 = vadd.f32 1.0, %v2968_v36  ;;  %v4047_v36 = vmov 0  }
 0x4a1   :  { %v1493_v24 = vadd.f32 %v1489_v3, %v1329_v37  ;;  %v1490_v52 = vmul.f32 %v2970_v12, %v1436_v35 }
 0x4a3   :  { %2979 = vtanh.f32 %v1493_v24  ;;  %v1494_v30 = vadd.f32 %v1490_v52, %v1332_v4 }
 0x4a4   :  { %2981 = vrcp.f32 %v1481_v7  ;;  %v2817_v7 = vld [vmem:[#allocation2 + $0x50] sm:$0xff]  }
 0x4a5   :  { %v2972_v0 = vpop.eup %2971  ;;  %2983 = vtanh.f32 %v1494_v30 }
 0x4a6   :  { %v2974_v56 = vpop.eup %2973  ;;  %v1499_v50 = vsub.f32 %v3743_v46, %v2972_v0  ;;  %2985 = vrcp.f32 %v1482_v62 }
 0x4a7   :  { %v2976_v34 = vpop.eup %2975 }
 0x4a8   :  { %v1500_v6 = vsub.f32 %v3745_v44, %v2976_v34  ;;  %v1503_v60 = vmul.f32 %v2974_v56, %v1499_v50  ;;  %v2978_v42 = vpop.eup %2977 }
 0x4aa   :  { %v1504_v40 = vmul.f32 %v2978_v42, %v1500_v6  ;;  %v3885_v63 = vadd.f32 %v2972_v0, %v1503_v60 }
 0x4ac   :  { %v3887_v8 = vadd.f32 %v2976_v34, %v1504_v40 }
 0x4ad   :  { %v2980_v49 = vpop.eup %2979 }
 0x4ae   :  { %v2982_v11 = vpop.eup %2981  ;;  %v1634_v55 = vpack.c.bf16 %v3887_v8, %v3885_v63  ;;  %v1501_v13 = vsub.f32 %v3753_v43, %v2980_v49 }
 0x4af   :  { %v2984_v47 = vpop.eup %2983 }
 0x4b0   :  { %1669 = vmatmul.mubr.bf16.vlgmr.msra.gmra.mrb[36].mxu0 %v1634_v55  ;;  %2559 = vmatprep.mubr.bf16.mxu1 %v1634_v55  ;;  %v1502_v46 = vsub.f32 %v3758_v61, %v2984_v47  ;;  %v1505_v44 = vmul.f32 %v2982_v11, %v1501_v13  ;;  %v2986_v18 = vpop.eup %2985 }
 0x4b1   :  { %1678 = vmatprep.mubr.bf16.mxu0 %v4047_v36  ;;  %2564 = vmatpush3.bf16.msra.mxu0 %v3712_v10  ;;  %v3909_v10 = vpop.f32.mrb[28].mxu1 }
 0x4b2   :  { %v1506_v37 = vmul.f32 %v2986_v18, %v1502_v46  ;;  %v3895_v3 = vadd.f32 %v2980_v49, %v1505_v44  ;;  %2565 = vmatprep.subr.bf16.mxu0 %v3755_v9 }
 0x4b4   :  { %v3898_v35 = vadd.f32 %v2984_v47, %v1506_v37 }
 0x4b5   :  { %2566 = vmatpush3.bf16.msra.mxu0 %v3755_v9  ;;  %v3911_v9 = vpop.f32.mrb[29].mxu1 }
 0x4b6   :  { %v1635_v43 = vpack.c.bf16 %v3898_v35, %v3895_v3  ;;  %2571 = vmatprep.subr.bf16.mxu0 %v3763_v54  ;;  %v3913_v61 = vpop.f32.mrb[30].mxu1 }
 0x4b7   :  { %v3915_v12 = vpop.f32.mrb[31].mxu1 }
 0x4b8   :  { %1679 = vmatmul.mubr.bf16.gmra.mrb[40].mxu0 %v1635_v43  ;;  %2560 = vmatmul.mubr.bf16.vlgmr.msra.gmra.mrb[32].mxu1 %v1635_v43  ;;  %v1620_v43 = vadd.f32 %v3911_v9, %v3534_v57 }
 0x4b9   :  { %1832 = vmatpush1.bf16.msra.mxu1 %v3660_v41  ;;  %1863 = vmatprep.mubr.bf16.mxu1 %v4047_v36  ;;  %v2818_v41 = vld [vmem:[#allocation2 + $0x58] sm:$0xff]  }
 0x4ba   :  { %1833 = vmatprep.subr.bf16.mxu1 %v3664_v5  ;;  %2567 = vmatprep.mubr.msk.bf16.mxu0 %vm203_vm0, %v2817_v7 }
 0x4bd   :  { %1834 = vmatpush1.bf16.msra.mxu1 %v3667_v58 }
 0x4be   :  { %1935 = vmatprep.subr.bf16.mxu1 %v3770_v1 }
 0x4c0   :  { %2316 = vmatmul.mubr.msk.bf16.vlgmr.msra.gmra.mrb[36].mxu1 %vm203_vm0, %v2817_v7  ;;  %2568 = vmatmul.mubr.msk.bf16.vlgmr.msra.gmra.mrb[44].mxu0 %vm203_vm0, %v2818_v41 }
 0x4c1   :  { %1936 = vmatpush1.bf16.msra.mxu1 %v3783_v14  ;;  %1873 = vmatprep.mubr.bf16.mxu1 %v4047_v36 }
 0x4c2   :  { %1937 = vmatprep.subr.bf16.mxu1 %v3787_v15  ;;  %2572 = vmatpush3.bf16.msra.mxu0 %v3763_v54 }
 0x4c3   :  { %2573 = vmatprep.subr.bf16.mxu0 %v3805_v21 }
 0x4c5   :  { %1938 = vmatpush1.bf16.msra.mxu1 %v3790_v16 }
 0x4c6   :  { %1939 = vmatprep.subr.bf16.mxu1 %v3793_v17  ;;  %2574 = vmatpush3.bf16.msra.mxu0 %v3805_v21 }
 0x4c7   :  { %2575 = vmatprep.subr.bf16.mxu0 %v3816_v25 }
 0x4c8   :  { %2317 = vmatmul.mubr.msk.bf16.gmra.mrb[40].mxu1 %vm203_vm0, %v2818_v41 }
 0x4c9   :  { %1940 = vmatpush1.bf16.msra.mxu1 %v3798_v19  ;;  %1967 = vmatprep.mubr.bf16.mxu1 %v4047_v36 }
 0x4ca   :  { %1941 = vmatprep.subr.bf16.mxu1 %v3802_v20  ;;  %2576 = vmatpush3.bf16.msra.mxu0 %v3816_v25 }
 0x4cb   :  { %2577 = vmatprep.subr.bf16.mxu0 %v3826_v39 }
 0x4cd   :  { %1942 = vmatpush1.bf16.msra.mxu1 %v3809_v22 }
 0x4ce   :  { %1943 = vmatprep.subr.bf16.mxu1 %v3813_v23  ;;  %2578 = vmatpush3.bf16.msra.mxu0 %v3826_v39 }
 0x4cf   :  { %2579 = vmatprep.subr.bf16.mxu0 %v3836_v31 }
 0x4d1   :  { %1944 = vmatpush1.bf16.msra.mxu1 %v3819_v26 }
 0x4d2   :  { %1945 = vmatprep.subr.bf16.mxu1 %v3823_v27  ;;  %2580 = vmatpush3.bf16.msra.mxu0 %v3836_v31 }
 0x4d3   :  { %2581 = vmatprep.subr.bf16.mxu0 %v3846_v33 }
 0x4d5   :  { %1946 = vmatpush1.bf16.msra.mxu1 %v3829_v28 }
 0x4d6   :  { %1947 = vmatprep.subr.bf16.mxu1 %v3833_v29  ;;  %2582 = vmatpush3.bf16.msra.mxu0 %v3846_v33 }
 0x4d7   :  { %2583 = vmatprep.subr.bf16.mxu0 %v3853_v2 }
 0x4d9   :  { %1948 = vmatpush1.bf16.msra.mxu1 %v3839_v53 }
 0x4da   :  { %1949 = vmatprep.subr.bf16.mxu1 %v3843_v32  ;;  %2584 = vmatpush3.bf16.msra.mxu0 %v3853_v2 }
 0x4db   :  { %2585 = vmatprep.subr.bf16.mxu0 %v3858_v38 }
 0x4dd   :  { %1950 = vmatpush1.bf16.msra.mxu1 %v3849_v45 }
 0x4de   :  { %2586 = vmatpush3.bf16.msra.mxu0 %v3858_v38 }
 0x583   :  { %v1670_v5 = vpop.f32.mrb[36].mxu0 }
 0x584   :  { %v2676_v58 = vadd.f32 %v3519_v51, %v1670_v5  ;;  %v1672_v54 = vpop.f32.mrb[37].mxu0 }
 0x585   :  { %v1674_v1 = vpop.f32.mrb[38].mxu0  ;;  %v2678_v20 = vadd.f32 %v3522_v59, %v1672_v54  ;;  %v1623_v54 = vadd.f32 %v3915_v12, %v3534_v57 }
 0x586   :  { %v1742_v14 = vsub.f32 0.0, %v2676_v58  ;;  %v2680_v15 = vadd.f32 %v3519_v51, %v1674_v1  ;;  %v1676_v16 = vpop.f32.mrb[39].mxu0 }
 0x587   :  { %v2682_v25 = vadd.f32 %v3522_v59, %v1676_v16  ;;  %v1766_v31 = vsub.f32 0.0, %v2678_v20 }
 0x588   :  { %v1746_v17 = vmul.f32 1.442695, %v1742_v14  ;;  %v1743_v19 = vsub.f32 0.0, %v2680_v15 }
 0x589   :  { %v1767_v2 = vsub.f32 0.0, %v2682_v25  ;;  %v1770_v24 = vmul.f32 1.442695, %v1766_v31 }
 0x58a   :  { %2987 = vpow2.f32 %v1746_v17  ;;  %v1748_v21 = vmul.f32 1.442695, %v1743_v19 }
 0x58b   :  { %v1680_v22 = vpop.f32.mrb[40].mxu0  ;;  %v2561_v23 = vpop.f32.mrb[32].mxu1  ;;  %v1772_v0 = vmul.f32 1.442695, %v1767_v2 }
 0x58c   :  { %2989 = vpow2.f32 %v1748_v21  ;;  %v2684_v26 = vadd.f32 %v3519_v51, %v1680_v22  ;;  %v1682_v27 = vpop.f32.mrb[41].mxu0  ;;  %v1723_v39 = vpop.f32.mrb[33].mxu1  ;;  %v1732_v19 = vadd.f32 %v2561_v23, %v3532_v48  ;;  %v1628_v21 = vadd.f32 %v3909_v10, %v3534_v57 }
 0x58d   :  { %v1684_v28 = vpop.f32.mrb[42].mxu0  ;;  %v2562_v29 = vpop.f32.mrb[34].mxu1  ;;  %v2686_v52 = vadd.f32 %v3522_v59, %v1682_v27  ;;  %v1724_v44 = vadd.f32 %v1723_v39, %v3532_v48  ;;  %v1631_v27 = vadd.f32 %v3913_v61, %v3534_v57 }
 0x58e   :  { %v1744_v53 = vsub.f32 0.0, %v2684_v26  ;;  %v2688_v32 = vadd.f32 %v3519_v51, %v1684_v28  ;;  %v1686_v33 = vpop.f32.mrb[43].mxu0  ;;  %v1726_v45 = vpop.f32.mrb[35].mxu1  ;;  %v1735_v25 = vadd.f32 %v2562_v29, %v3532_v48 }
 0x58f   :  { %v2690_v56 = vadd.f32 %v3522_v59, %v1686_v33  ;;  %v1768_v6 = vsub.f32 0.0, %v2686_v52  ;;  %v1727_v41 = vadd.f32 %v1726_v45, %v3532_v48 }
 0x590   :  { %v1750_v38 = vmul.f32 1.442695, %v1744_v53  ;;  %v1745_v4 = vsub.f32 0.0, %v2688_v32 }
 0x591   :  { %v1769_v42 = vsub.f32 0.0, %v2690_v56  ;;  %v1774_v40 = vmul.f32 1.442695, %v1768_v6 }
 0x592   :  { %2991 = vpow2.f32 %v1750_v38  ;;  %v1752_v30 = vmul.f32 1.442695, %v1745_v4 }
 0x593   :  { %v1776_v11 = vmul.f32 1.442695, %v1769_v42 }
 0x594   :  { %v2988_v62 = vpop.eup %2987  ;;  %2993 = vpow2.f32 %v1752_v30 }
 0x595   :  { %v1754_v50 = vadd.f32 1.0, %v2988_v62  ;;  %2995 = vpow2.f32 %v1770_v24 }
 0x596   :  { %v2990_v34 = vpop.eup %2989 }
 0x597   :  { %2997 = vrcp.f32 %v1754_v50  ;;  %v1755_v60 = vadd.f32 1.0, %v2990_v34 }
 0x598   :  { %2999 = vpow2.f32 %v1772_v0 }
 0x599   :  { %3001 = vrcp.f32 %v1755_v60 }
 0x59a   :  { %3003 = vpow2.f32 %v1774_v40 }
 0x59c   :  { %v2992_v49 = vpop.eup %2991 }
 0x59d   :  { %v1756_v55 = vadd.f32 1.0, %v2992_v49  ;;  %v2819_v49 = vld [vmem:[#allocation8] sm:$0xff]  }
 0x59e   :  { %v2994_v13 = vpop.eup %2993  ;;  %2591 = vmatprep.subr.bf16.mxu1 %v2819_v49 }
 0x59f   :  { %3005 = vrcp.f32 %v1756_v55  ;;  %v1757_v47 = vadd.f32 1.0, %v2994_v13  ;;  %v2996_v46 = vpop.eup %2995  ;;  %v2822_v55 = vld [vmem:[#allocation8 + $0x18] sm:$0xff]   ;;  %v2823_v13 = vld [vmem:[#allocation8 + $0x20] sm:$0xff]  }
 0x5a0   :  { %3007 = vpow2.f32 %v1776_v11  ;;  %v1778_v58 = vadd.f32 1.0, %v2996_v46  ;;  %v2821_v11 = vld [vmem:[#allocation8 + $0x10] sm:$0xff]  }
 0x5a1   :  { %v2998_v18 = vpop.eup %2997  ;;  %3009 = vrcp.f32 %v1757_v47  ;;  %v2824_v47 = vld [vmem:[#allocation8 + $0x28] sm:$0xff]   ;;  %v2825_v46 = vld [vmem:[#allocation8 + $0x30] sm:$0xff]  }
 0x5a2   :  { %v3000_v37 = vpop.eup %2999  ;;  %v1786_v7 = vmul.f32 %v2998_v18, %v1724_v44  ;;  %v2826_v44 = vld [vmem:[#allocation8 + $0x38] sm:$0xff]  }
 0x5a3   :  { %v3002_v5 = vpop.eup %3001  ;;  %v1779_v15 = vadd.f32 1.0, %v3000_v37 }
 0x5a4   :  { %v1790_v1 = vadd.f32 %v1786_v7, %v1620_v43  ;;  %v1787_v14 = vmul.f32 %v3002_v5, %v1727_v41  ;;  %v3004_v17 = vpop.eup %3003 }
 0x5a5   :  { %v1780_v26 = vadd.f32 1.0, %v3004_v17 }
 0x5a6   :  { %3011 = vtanh.f32 %v1790_v1  ;;  %v1791_v16 = vadd.f32 %v1787_v14, %v1623_v54 }
 0x5a7   :  { %3013 = vrcp.f32 %v1778_v58 }
 0x5a8   :  { %3015 = vtanh.f32 %v1791_v16 }
 0x5a9   :  { %v3006_v20 = vpop.eup %3005  ;;  %3017 = vrcp.f32 %v1779_v15 }
 0x5aa   :  { %v3008_v9 = vpop.eup %3007  ;;  %v1788_v22 = vmul.f32 %v3006_v20, %v1732_v19 }
 0x5ab   :  { %v3010_v12 = vpop.eup %3009  ;;  %v1781_v23 = vadd.f32 1.0, %v3008_v9 }
 0x5ac   :  { %v1792_v39 = vadd.f32 %v1788_v22, %v1628_v21  ;;  %v1789_v28 = vmul.f32 %v3010_v12, %v1735_v25 }
 0x5ae   :  { %3019 = vtanh.f32 %v1792_v39  ;;  %v1793_v31 = vadd.f32 %v1789_v28, %v1631_v27 }
 0x5af   :  { %3021 = vrcp.f32 %v1780_v26 }
 0x5b0   :  { %v3012_v53 = vpop.eup %3011  ;;  %3023 = vtanh.f32 %v1793_v31 }
 0x5b1   :  { %v3014_v32 = vpop.eup %3013  ;;  %v1798_v10 = vsub.f32 %v3885_v63, %v3012_v53  ;;  %3025 = vrcp.f32 %v1781_v23 }
 0x5b2   :  { %v3016_v33 = vpop.eup %3015 }
 0x5b3   :  { %v1799_v29 = vsub.f32 %v3887_v8, %v3016_v33  ;;  %v1802_v45 = vmul.f32 %v3014_v32, %v1798_v10  ;;  %v3018_v2 = vpop.eup %3017 }
 0x5b5   :  { %v1803_v38 = vmul.f32 %v3018_v2, %v1799_v29  ;;  %v3975_v4 = vadd.f32 %v3012_v53, %v1802_v45 }
 0x5b7   :  { %v3977_v61 = vadd.f32 %v3016_v33, %v1803_v38 }
 0x5b8   :  { %v3020_v24 = vpop.eup %3019 }
 0x5b9   :  { %v3022_v52 = vpop.eup %3021  ;;  %v1933_v30 = vpack.c.bf16 %v3977_v61, %v3975_v4  ;;  %v1800_v62 = vsub.f32 %v3895_v3, %v3020_v24  ;;  %v3990_v3 = vpop.f32.mrb[44].mxu0 }
 0x5ba   :  { %v3024_v0 = vpop.eup %3023  ;;  %v3992_v42 = vpop.f32.mrb[45].mxu0 }
 0x5bb   :  { %1968 = vmatmul.mubr.bf16.vlgmr.msra.gmra.mrb[36].mxu1 %v1933_v30  ;;  %2587 = vmatprep.mubr.bf16.mxu0 %v1933_v30  ;;  %v1801_v63 = vsub.f32 %v3898_v35, %v3024_v0  ;;  %v1804_v8 = vmul.f32 %v3022_v52, %v1800_v62  ;;  %v3026_v56 = vpop.eup %3025  ;;  %v3994_v40 = vpop.f32.mrb[46].mxu0 }
 0x5bc   :  { %1977 = vmatprep.mubr.bf16.mxu1 %v4047_v36  ;;  %v3996_v35 = vpop.f32.mrb[47].mxu0  ;;  %2592 = vmatpush3.bf16.msra.mxu1 %v2819_v49  ;;  %v2820_v36 = vld [vmem:[#allocation8 + $0x8] sm:$0xff]  }
 0x5bd   :  { %v1805_v50 = vmul.f32 %v3026_v56, %v1801_v63  ;;  %v3984_v34 = vadd.f32 %v3020_v24, %v1804_v8  ;;  %2593 = vmatprep.subr.bf16.mxu1 %v2820_v36 }
 0x5bf   :  { %v3986_v6 = vadd.f32 %v3024_v0, %v1805_v50 }
 0x5c0   :  { %2594 = vmatpush3.bf16.msra.mxu1 %v2820_v36 }
 0x5c1   :  { %v1934_v60 = vpack.c.bf16 %v3986_v6, %v3984_v34  ;;  %2595 = vmatprep.subr.bf16.mxu1 %v2821_v11 }
 0x5c3   :  { %1978 = vmatmul.mubr.bf16.gmra.mrb[40].mxu1 %v1934_v60  ;;  %2588 = vmatmul.mubr.bf16.vlgmr.msra.gmra.mrb[48].mxu0 %v1934_v60 }
 0x5c4   :  { %2596 = vmatpush3.bf16.msra.mxu1 %v2821_v11  ;;  %v1919_v11 = vadd.f32 %v3992_v42, %v3534_v57 }
 0x5c5   :  { %2597 = vmatprep.subr.bf16.mxu1 %v2822_v55 }
 0x5c8   :  { %2598 = vmatpush3.bf16.msra.mxu1 %v2822_v55 }
 0x5c9   :  { %2599 = vmatprep.subr.bf16.mxu1 %v2823_v13 }
 0x5cc   :  { %2600 = vmatpush3.bf16.msra.mxu1 %v2823_v13 }
 0x5cd   :  { %2601 = vmatprep.subr.bf16.mxu1 %v2824_v47 }
 0x5d0   :  { %2602 = vmatpush3.bf16.msra.mxu1 %v2824_v47 }
 0x5d1   :  { %2603 = vmatprep.subr.bf16.mxu1 %v2825_v46 }
 0x5d4   :  { %2604 = vmatpush3.bf16.msra.mxu1 %v2825_v46 }
 0x5d5   :  { %2605 = vmatprep.subr.bf16.mxu1 %v2826_v44 }
 0x5d8   :  { %2606 = vmatpush3.bf16.msra.mxu1 %v2826_v44  ;;  %v1922_v44 = vadd.f32 %v3996_v35, %v3534_v57 }
 0x68e   :  { %v1969_v18 = vpop.f32.mrb[36].mxu1 }
 0x68f   :  { %v2692_v37 = vadd.f32 %v3519_v51, %v1969_v18  ;;  %v1971_v43 = vpop.f32.mrb[37].mxu1 }
 0x690   :  { %v1973_v7 = vpop.f32.mrb[38].mxu1  ;;  %v2694_v14 = vadd.f32 %v3522_v59, %v1971_v43 }
 0x691   :  { %v2041_v41 = vsub.f32 0.0, %v2692_v37  ;;  %v2696_v5 = vadd.f32 %v3519_v51, %v1973_v7  ;;  %v1975_v58 = vpop.f32.mrb[39].mxu1 }
 0x692   :  { %v2698_v19 = vadd.f32 %v3522_v59, %v1975_v58  ;;  %v2065_v12 = vsub.f32 0.0, %v2694_v14 }
 0x693   :  { %v2045_v54 = vmul.f32 1.442695, %v2041_v41  ;;  %v2042_v1 = vsub.f32 0.0, %v2696_v5 }
 0x694   :  { %v2066_v31 = vsub.f32 0.0, %v2698_v19  ;;  %v2069_v32 = vmul.f32 1.442695, %v2065_v12 }
 0x695   :  { %3027 = vpow2.f32 %v2045_v54  ;;  %v2047_v15 = vmul.f32 1.442695, %v2042_v1  ;;  %v1927_v54 = vadd.f32 %v3990_v3, %v3534_v57 }
 0x696   :  { %v1979_v16 = vpop.f32.mrb[40].mxu1  ;;  %v2589_v17 = vpop.f32.mrb[48].mxu0  ;;  %v2071_v45 = vmul.f32 1.442695, %v2066_v31 }
 0x697   :  { %3029 = vpow2.f32 %v2047_v15  ;;  %v2700_v20 = vadd.f32 %v3519_v51, %v1979_v16  ;;  %v1981_v9 = vpop.f32.mrb[41].mxu1  ;;  %v2022_v21 = vpop.f32.mrb[49].mxu0  ;;  %v2031_v5 = vadd.f32 %v2589_v17, %v3532_v48  ;;  %v1930_v16 = vadd.f32 %v3994_v40, %v3534_v57 }
 0x698   :  { %v1983_v22 = vpop.f32.mrb[42].mxu1  ;;  %v2590_v25 = vpop.f32.mrb[50].mxu0  ;;  %v2702_v10 = vadd.f32 %v3522_v59, %v1981_v9 }
 0x699   :  { %v2043_v26 = vsub.f32 0.0, %v2700_v20  ;;  %v2704_v27 = vadd.f32 %v3519_v51, %v1983_v22  ;;  %v1985_v39 = vpop.f32.mrb[43].mxu1  ;;  %v2025_v28 = vpop.f32.mrb[51].mxu0  ;;  %v2034_v14 = vadd.f32 %v2590_v25, %v3532_v48 }
 0x69a   :  { %v2706_v2 = vadd.f32 %v3522_v59, %v1985_v39  ;;  %v2067_v52 = vsub.f32 0.0, %v2702_v10  ;;  %v2023_v59 = vadd.f32 %v2022_v21, %v3532_v48  ;;  %v2026_v13 = vadd.f32 %v2025_v28, %v3532_v48 }
 0x69b   :  { %v2049_v23 = vmul.f32 1.442695, %v2043_v26  ;;  %v2044_v53 = vsub.f32 0.0, %v2704_v27 }
 0x69c   :  { %v2068_v30 = vsub.f32 0.0, %v2706_v2  ;;  %v2073_v62 = vmul.f32 1.442695, %v2067_v52  ;;  %v2320_v2 = vld [vmem:[%s4043_s6] ss:$0 sm:$0xff] }
 0x69d   :  { %3031 = vpow2.f32 %v2049_v23  ;;  %v2051_v33 = vmul.f32 1.442695, %v2044_v53 }
 0x69e   :  { %v2075_v63 = vmul.f32 1.442695, %v2068_v30 }
 0x69f   :  { %v3028_v29 = vpop.eup %3027  ;;  %3033 = vpow2.f32 %v2051_v33 }
 0x6a0   :  { %v2053_v38 = vadd.f32 1.0, %v3028_v29  ;;  %3035 = vpow2.f32 %v2069_v32 }
 0x6a1   :  { %v3030_v24 = vpop.eup %3029 }
 0x6a2   :  { %3037 = vrcp.f32 %v2053_v38  ;;  %v2054_v51 = vadd.f32 1.0, %v3030_v24 }
 0x6a3   :  { %3039 = vpow2.f32 %v2071_v45 }
 0x6a4   :  { %3041 = vrcp.f32 %v2054_v51 }
 0x6a5   :  { %3043 = vpow2.f32 %v2073_v62 }
 0x6a7   :  { %v3032_v0 = vpop.eup %3031 }
 0x6a8   :  { %v2055_v8 = vadd.f32 1.0, %v3032_v0 }
 0x6a9   :  { %v3034_v56 = vpop.eup %3033 }
 0x6aa   :  { %3045 = vrcp.f32 %v2055_v8  ;;  %v2056_v50 = vadd.f32 1.0, %v3034_v56  ;;  %v3036_v60 = vpop.eup %3035 }
 0x6ab   :  { %3047 = vpow2.f32 %v2075_v63  ;;  %v2077_v46 = vadd.f32 1.0, %v3036_v60 }
 0x6ac   :  { %v3038_v49 = vpop.eup %3037  ;;  %3049 = vrcp.f32 %v2056_v50 }
 0x6ad   :  { %v3040_v36 = vpop.eup %3039  ;;  %v2085_v55 = vmul.f32 %v3038_v49, %v2023_v59 }
 0x6ae   :  { %v3042_v47 = vpop.eup %3041  ;;  %v2078_v43 = vadd.f32 1.0, %v3040_v36 }
 0x6af   :  { %v2089_v18 = vadd.f32 %v2085_v55, %v1919_v11  ;;  %v2086_v37 = vmul.f32 %v3042_v47, %v2026_v13  ;;  %v3044_v41 = vpop.eup %3043 }
 0x6b0   :  { %v2079_v15 = vadd.f32 1.0, %v3044_v41 }
 0x6b1   :  { %3051 = vtanh.f32 %v2089_v18  ;;  %v2090_v7 = vadd.f32 %v2086_v37, %v1922_v44 }
 0x6b2   :  { %3053 = vrcp.f32 %v2077_v46 }
 0x6b3   :  { %3055 = vtanh.f32 %v2090_v7 }
 0x6b4   :  { %v3046_v58 = vpop.eup %3045  ;;  %3057 = vrcp.f32 %v2078_v43 }
 0x6b5   :  { %v3048_v42 = vpop.eup %3047  ;;  %v2087_v1 = vmul.f32 %v3046_v58, %v2031_v5 }
 0x6b6   :  { %v3050_v35 = vpop.eup %3049  ;;  %v2080_v17 = vadd.f32 1.0, %v3048_v42 }
 0x6b7   :  { %v2091_v19 = vadd.f32 %v2087_v1, %v1927_v54  ;;  %v2088_v20 = vmul.f32 %v3050_v35, %v2034_v14 }
 0x6b9   :  { %3059 = vtanh.f32 %v2091_v19  ;;  %v2092_v9 = vadd.f32 %v2088_v20, %v1930_v16 }
 0x6ba   :  { %3061 = vrcp.f32 %v2079_v15 }
 0x6bb   :  { %v3052_v21 = vpop.eup %3051  ;;  %3063 = vtanh.f32 %v2092_v9 }
 0x6bc   :  { %v3054_v22 = vpop.eup %3053  ;;  %v2097_v3 = vsub.f32 %v3975_v4, %v3052_v21  ;;  %3065 = vrcp.f32 %v2080_v17 }
 0x6bd   :  { %v3056_v12 = vpop.eup %3055 }
 0x6be   :  { %v2098_v48 = vsub.f32 %v3977_v61, %v3056_v12  ;;  %v2101_v25 = vmul.f32 %v3054_v22, %v2097_v3  ;;  %v3058_v26 = vpop.eup %3057 }
 0x6c0   :  { %v2102_v27 = vmul.f32 %v3058_v26, %v2098_v48  ;;  %v2105_v39 = vadd.f32 %v3052_v21, %v2101_v25 }
 0x6c2   :  { %v2106_v57 = vadd.f32 %v3056_v12, %v2102_v27 }
 0x6c3   :  { %v3060_v40 = vpop.eup %3059 }
 0x6c4   :  { %v3062_v28 = vpop.eup %3061  ;;  %v2099_v31 = vsub.f32 %v3984_v34, %v3060_v40  ;;  %v2109_v23 = vpack.c.bf16 %v2106_v57, %v2105_v39 }
 0x6c5   :  { %v3064_v53 = vpop.eup %3063 }
 0x6c6   :  { %v2100_v32 = vsub.f32 %v3986_v6, %v3064_v53  ;;  %2607 = vmatprep.mubr.bf16.mxu1 %v2109_v23  ;;  %v2103_v10 = vmul.f32 %v3062_v28, %v2099_v31  ;;  %v3066_v4 = vpop.eup %3065 }
 0x6c8   :  { %v2104_v33 = vmul.f32 %v3066_v4, %v2100_v32  ;;  %v2107_v29 = vadd.f32 %v3060_v40, %v2103_v10 }
 0x6ca   :  { %v2108_v45 = vadd.f32 %v3064_v53, %v2104_v33 }
 0x6cc   :  { %v2110_v61 = vpack.c.bf16 %v2108_v45, %v2107_v29 }
 0x6ce   :  { %2608 = vmatmul.mubr.bf16.vlgmr.msra.gmra.mrb[44].mxu1 %v2110_v61 }
 0x7a1   :  { %v2609_v38 = vpop.f32.mrb[44].mxu1 }
 0x7a2   :  { %v2225_v34 = vadd.f32 %v2609_v38, %v2320_v2  ;;  %v2216_v24 = vpop.f32.mrb[45].mxu1 }
 0x7a3   :  { %v2217_v52 = vadd.f32 %v2320_v2, %v2216_v24  ;;  %v2610_v51 = vpop.f32.mrb[46].mxu1 }
 0x7a4   :  { %2233 = vst [vmem:[#allocation10 + $0x10] sm:$0xff] %v2225_v34  ;;  %v2228_v6 = vadd.f32 %v2610_v51, %v2320_v2  ;;  %v2219_v30 = vpop.f32.mrb[47].mxu1 }
 0x7a5   :  { %2231 = vst [vmem:[#allocation10] sm:$0xff] %v2217_v52  ;;  %v2220_v62 = vadd.f32 %v2320_v2, %v2219_v30 }
 0x7a6   :  { %2234 = vst [vmem:[#allocation10 + $0x18] sm:$0xff] %v2228_v6 }
 0x7a7   :  { %2232 = vst [vmem:[#allocation10 + $0x8] sm:$0xff] %v2220_v62 }
 0x7a8   :  { %3196 = shalt.err (!%p3193_p8)
}
 0x7a9   :  { %s3197_s10 = scalar_lea.hbm %s4044_s7, 512 }
 0x7aa   :  { %p3198_p9 = scmp.ne.s32.totalorder %s4044_s7, %s3197_s10  ;;  %p3201_p10 = scmp.lt.u32.totalorder %s3197_s10, %s4044_s7 }
 0x7ac   :  { %p3203_p11 = pnand %p3201_p10, %p3198_p9 }
 0x7ae   :  { %3206 = shalt.err (!%p3203_p11)
}
 0x7af   :  { %s3225_s18 = smov 128   ;;  %s3226_s0 = smov 8  }
 0x7b0   :  { %2246 = dma.vmem_to_hbm [thread:$0]  %s2241_s30, 512, %s4044_s7, [#allocation4], %s3225_s18, %s3225_s18, %s3226_s0  }
 0x7b1   :  { %3213 = dma.done.wait [#allocation4], 512  }
 0x7b2   :  { %3214 = vsyncadd [#allocation4], 4294966784 }
 0x7b3   :  { %2250 = vsyncpa [#allocation3], 1 }
 0x7b4   :  { %2251 = vsyncpa [#allocation6], 1 }
 0x7b5   :  { %2252 = vsyncpa [#allocation9], 1 }
 0x7b6   :  { %2253 = vsyncpa [#allocation4], 1 }

</bundles_post_ra>
